<compile_context>
chip_gen: v7x
topology: tpu7x:2x2x1
jax: 0.10.0
libtpu: 0.0.40
codegen_flags: <defaults>
</compile_context>

<pallas_src>
import functools

import jax
import jax.numpy as jnp
from jax.experimental import pallas as pl
from jax.experimental.pallas import tpu as pltpu


def _slice_kernel(x_ref, w_in_ref, b_in_ref, w_sl_ref, b_sl_ref, ones_bd_ref,
                  w_qkv_ref, w_ot_ref, sw_ref, m_ref, st_acc, sn_acc,
                  *, heads_per_block, dim_head, slice_num, scale):
    Hs, D, G = heads_per_block, dim_head, slice_num
    inner_s = Hs * D
    n = pl.program_id(2)

    @pl.when(n == 0)
    def _():
        st_acc[...] = jnp.zeros_like(st_acc)
        sn_acc[...] = jnp.zeros_like(sn_acc)

    x = x_ref[0]                                                    # (Nt, C) bf16

    # Fused per-head input projections for this head split: [fx_mid | x_mid].
    proj = jax.lax.dot_general(x, w_in_ref[...], (((1,), (1,)), ((), ())),
                               preferred_element_type=jnp.float32) + b_in_ref[...]
    fx = proj[:, :inner_s].astype(jnp.bfloat16)                     # (Nt, inner_s)
    xm = proj[:, inner_s:].astype(jnp.bfloat16)                     # (Nt, inner_s)

    # Slice logits for all owned heads at once (temperature folded into w_sl/b_sl).
    logits = jnp.dot(xm, w_sl_ref[...],
                     preferred_element_type=jnp.float32) + b_sl_ref[...]  # (Nt, Hs*G)

    # Grouped (per-head) softmax, full lane width — no sub-128-lane slicing:
    #   * shift by the per-row GLOBAL max (identical math to per-group max; safe
    #     unless per-head logit ranges differ by ~>80),
    #   * per-group sums broadcast to every lane of the group via one block-diagonal
    #     ones matmul on the MXU.
    row_max = jnp.max(logits, axis=-1, keepdims=True)
    e = jnp.exp(logits - row_max)
    gsum = jnp.dot(e.astype(jnp.bfloat16), ones_bd_ref[...],
                   preferred_element_type=jnp.float32)              # (Nt, Hs*G)
    sw = e * pl.reciprocal(gsum, approx=True)
    sw_bf = sw.astype(jnp.bfloat16)
    sw_ref[0] = sw_bf                                               # ONE lane-dense store

    # Unnormalised slice tokens for all owned heads in one MXU-shaped matmul
    # (contraction over Nt); diagonal (D, G) blocks extracted only at finalize.
    st_acc[...] += jax.lax.dot_general(fx, sw_bf, (((0,), (0,)), ((), ())),
                                       preferred_element_type=jnp.float32)
    # Slice norms, full width (no per-head masked RMWs).
    sn_acc[...] += jnp.sum(sw, axis=0, keepdims=True)

    # Finalize once per (batch, head-split): tiny GxG attention + fold W_o into M.
    @pl.when(n == pl.num_programs(2) - 1)
    def _():
        inv_norm = pl.reciprocal(sn_acc[...] + 1e-5, approx=True)   # (1, Hs*G)
        w_ot = w_ot_ref[...]                                        # (inner_s, C)
        for h in range(Hs):                                         # tiny static unroll
            gs, ge = h * G, (h + 1) * G
            ds_, de = h * D, (h + 1) * D
            st_t = st_acc[ds_:de, gs:ge] * inv_norm[:, gs:ge]       # (D, G) = token^T
            # Fused q/k/v (shared weights across heads): (G, 3*D).
            qkv = jax.lax.dot_general(st_t, w_qkv_ref[...], (((0,), (0,)), ((), ())),
                                      preferred_element_type=jnp.float32)
            qh = qkv[:, 0:D]
            kh = qkv[:, D:2 * D]
            vh = qkv[:, 2 * D:3 * D]
            dots = jax.lax.dot_general(qh, kh, (((1,), (1,)), ((), ())),
                                       preferred_element_type=jnp.float32) * scale
            dots = dots - jnp.max(dots, axis=-1, keepdims=True)
            ae = jnp.exp(dots)
            attn = ae * pl.reciprocal(jnp.sum(ae, axis=-1, keepdims=True), approx=True)
            out_tok = jnp.dot(attn, vh, preferred_element_type=jnp.float32)   # (G, D)
            # Row-block of M: de-slice map composed with the output projection.
            m_ref[0, gs:ge, :] = jnp.dot(
                out_tok, w_ot[ds_:de, :],
                preferred_element_type=jnp.float32).astype(m_ref.dtype)


def _deslice_kernel(sw_ref, m_ref, b_o_ref, out_ref):
    acc = jnp.dot(sw_ref[0], m_ref[0], preferred_element_type=jnp.float32)
    out_ref[0] = (acc + b_o_ref[...]).astype(out_ref.dtype)


def physics_attention_pallas(x, params, *, heads, dim_head, slice_num,
                             block_n=None, head_splits=None, out_dtype=None):
    B, N, C = x.shape
    H, D, G = heads, dim_head, slice_num
    inner = H * D
    HG = H * G
    scale = float(D) ** -0.5
    f32, bf16 = jnp.float32, jnp.bfloat16
    out_dtype = x.dtype if out_dtype is None else out_dtype

    # Head-split "parallel" grid axis (feeds both TensorCores on v7x at small B).
    # Auto-enable only when the split blocks stay lane-aligned (multiples of 128).
    if head_splits is None:
        head_splits = 1
        if H % 2 == 0:
            hs2 = H // 2
            if (hs2 * G) % 128 == 0 and (hs2 * D) % 64 == 0:
                head_splits = 2
    assert H % head_splits == 0, "heads must divide evenly across head_splits"
    Hs = H // head_splits
    inner_s = Hs * D
    HGs = Hs * G

    if block_n is None:
        block_n = next((c for c in (2048, 1024, 512, 256, 128) if N % c == 0), N)
    assert N % block_n == 0, "N must be divisible by block_n"
    assert block_n == N or block_n % 8 == 0, "block_n must be a multiple of 8"
    n_tiles = N // block_n

    # bf16 x halves kernel A's dominant HBM read stream (no-op if already bf16).
    x_bf = x.astype(bf16)

    temp = params["temperature"].reshape(H).astype(f32)

    # Per-split fused input projection: split s gets rows [W_fx(split s); W_x(split s)].
    w_fx = params["W_fx"].astype(f32)
    w_x = params["W_x"].astype(f32)
    b_fx = params["b_fx"].astype(f32)
    b_x = params["b_x"].astype(f32)
    w_in_blocks, b_in_blocks = [], []
    for s in range(head_splits):
        r0, r1 = s * inner_s, (s + 1) * inner_s
        w_in_blocks += [w_fx[r0:r1], w_x[r0:r1]]
        b_in_blocks += [b_fx[r0:r1], b_x[r0:r1]]
    w_in = jnp.concatenate(w_in_blocks, axis=0).astype(bf16)     # (splits*2*inner_s, C)
    b_in = jnp.concatenate(b_in_blocks).reshape(1, head_splits * 2 * inner_s).astype(f32)

    # Block-diagonal slice projection (all heads), per-head temperature folded in.
    w_slice_t = params["W_slice"].T.astype(f32)                   # (D, G)
    w_sl = jnp.zeros((inner, HG), f32)
    for h in range(H):
        w_sl = w_sl.at[h * D:(h + 1) * D, h * G:(h + 1) * G].set(w_slice_t / temp[h])
    w_sl = w_sl.astype(bf16)
    b_sl = jnp.concatenate(
        [params["b_slice"].astype(f32) / temp[h] for h in range(H)]).reshape(1, HG)

    # Block-diagonal ones for the grouped-softmax denominators (same for every split).
    ones_bd = jnp.kron(jnp.eye(Hs, dtype=f32), jnp.ones((G, G), f32)).astype(bf16)

    # Fused QKV (shared across heads) and transposed output projection.
    w_qkv = jnp.concatenate(
        [params["W_q"].T, params["W_k"].T, params["W_v"].T], axis=1).astype(f32)  # (D, 3D)
    w_ot = params["W_o"].T.astype(f32)                            # (inner, C)
    b_o = params["b_o"].reshape(1, C).astype(f32)

    kernel_a = functools.partial(_slice_kernel, heads_per_block=Hs, dim_head=D,
                                 slice_num=G, scale=scale)
    sw, m = pl.pallas_call(
        kernel_a,
        out_shape=(jax.ShapeDtypeStruct((B, N, HG), bf16),    # slice weights
                   jax.ShapeDtypeStruct((B, HG, C), bf16)),   # fused de-slice+W_o map
        grid_spec=pltpu.PrefetchScalarGridSpec(
            num_scalar_prefetch=0,
            grid=(B, head_splits, n_tiles),
            in_specs=[
                pl.BlockSpec((1, block_n, C), lambda b, s, n: (b, n, 0)),      # x tile
                pl.BlockSpec((2 * inner_s, C), lambda b, s, n: (s, 0)),        # W_fx|W_x
                pl.BlockSpec((1, 2 * inner_s), lambda b, s, n: (0, s)),        # b_fx|b_x
                pl.BlockSpec((inner_s, HGs), lambda b, s, n: (s, s)),          # W_slice bd
                pl.BlockSpec((1, HGs), lambda b, s, n: (0, s)),                # b_slice
                pl.BlockSpec((HGs, HGs), lambda b, s, n: (0, 0)),              # group ones
                pl.BlockSpec((D, 3 * D), lambda b, s, n: (0, 0)),              # W_qkv
                pl.BlockSpec((inner_s, C), lambda b, s, n: (s, 0)),            # W_o^T block
            ],
            out_specs=[
                pl.BlockSpec((1, block_n, HGs), lambda b, s, n: (b, n, s)),    # sw tile
                pl.BlockSpec((1, HGs, C), lambda b, s, n: (b, s, 0)),          # M block
            ],
            scratch_shapes=[pltpu.VMEM((inner_s, HGs), f32),   # slice-token accumulator
                            pltpu.VMEM((1, HGs), f32)],        # slice-norm accumulator
        ),
        compiler_params=pltpu.CompilerParams(
            dimension_semantics=("parallel", "parallel", "arbitrary")),
    )(x_bf, w_in, b_in, w_sl, b_sl, ones_bd, w_qkv, w_ot)

    out = pl.pallas_call(
        _deslice_kernel,
        out_shape=jax.ShapeDtypeStruct((B, N, C), out_dtype),
        grid_spec=pltpu.PrefetchScalarGridSpec(
            num_scalar_prefetch=0,
            grid=(B, n_tiles),
            in_specs=[
                pl.BlockSpec((1, block_n, HG), lambda b, n: (b, n, 0)),        # sw tile
                pl.BlockSpec((1, HG, C), lambda b, n: (b, 0, 0)),              # M (bf16)
                pl.BlockSpec((1, C), lambda b, n: (0, 0)),                     # b_o
            ],
            out_specs=pl.BlockSpec((1, block_n, C), lambda b, n: (b, n, 0)),
        ),
        compiler_params=pltpu.CompilerParams(
            dimension_semantics=("parallel", "parallel")),
    )(sw, m, b_o)
    return out


def physics_attention_reference(x, params, *, heads, dim_head, slice_num):
    """Pure-JAX f32 reference mirroring the PyTorch forward (dropout=0)."""
    B, N, C = x.shape
    H, D, G = heads, dim_head, slice_num
    fx_mid = (x @ params["W_fx"].T + params["b_fx"]).reshape(B, N, H, D).transpose(0, 2, 1, 3)
    x_mid = (x @ params["W_x"].T + params["b_x"]).reshape(B, N, H, D).transpose(0, 2, 1, 3)
    logits = (x_mid @ params["W_slice"].T + params["b_slice"]) / params["temperature"].reshape(1, H, 1, 1)
    sw = jax.nn.softmax(logits, axis=-1)
    snorm = sw.sum(2)
    st = jnp.einsum("bhnc,bhng->bhgc", fx_mid, sw)
    st = st / (snorm + 1e-5)[..., None]
    q = st @ params["W_q"].T
    k = st @ params["W_k"].T
    v = st @ params["W_v"].T
    dots = jnp.matmul(q, jnp.swapaxes(k, -1, -2)) * (float(D) ** -0.5)
    attn = jax.nn.softmax(dots, axis=-1)
    out_token = jnp.matmul(attn, v)
    out_x = jnp.einsum("bhgc,bhng->bhnc", out_token, sw)
    out_x = out_x.transpose(0, 2, 1, 3).reshape(B, N, H * D)
    return out_x @ params["W_o"].T + params["b_o"]


def make_params(key, dim, heads, dim_head, slice_num):
    inner_dim = heads * dim_head
    ks = jax.random.split(key, 10)
    p = {
        "W_fx": 0.1 * jax.random.normal(ks[0], (inner_dim, dim), jnp.float32),
        "b_fx": 0.1 * jax.random.normal(ks[1], (inner_dim,), jnp.float32),
        "W_x": 0.1 * jax.random.normal(ks[2], (inner_dim, dim), jnp.float32),
        "b_x": 0.1 * jax.random.normal(ks[3], (inner_dim,), jnp.float32),
        "W_slice": 0.2 * jax.random.normal(ks[4], (slice_num, dim_head), jnp.float32),
        "b_slice": 0.1 * jax.random.normal(ks[5], (slice_num,), jnp.float32),
        "W_q": 0.1 * jax.random.normal(ks[6], (dim_head, dim_head), jnp.float32),
        "W_k": 0.1 * jax.random.normal(ks[7], (dim_head, dim_head), jnp.float32),
        "W_v": 0.1 * jax.random.normal(ks[8], (dim_head, dim_head), jnp.float32),
        "W_o": 0.1 * jax.random.normal(ks[9], (dim, inner_dim), jnp.float32),
        "b_o": jnp.zeros((dim,), jnp.float32),
        "temperature": jnp.full((heads,), 0.5, jnp.float32),  # nn.Parameter ones * 0.5
    }
    # TODO(synk): PyTorch uses orthogonal_ init for in_project_slice; plain normal here
    # (init scheme only, forward semantics unaffected).
    return p


if __name__ == "__main__":
    # Small config chosen so the head-split / lane-dense paths are exercised
    # (HG = 256, per-split HG = 128) while staying cheap: B=2, N=256, C=64.
    B, N = 2, 256
    dim, heads, dim_head, slice_num = 64, 4, 32, 64
    block_n = 64   # 4 N-tiles: exercises the tiled two-pass accumulation path

    key = jax.random.PRNGKey(0)
    kx, kp = jax.random.split(key)
    x = jax.random.normal(kx, (B, N, dim), jnp.float32)
    params = make_params(kp, dim, heads, dim_head, slice_num)

    fn = jax.jit(functools.partial(physics_attention_pallas, heads=heads,
                                   dim_head=dim_head, slice_num=slice_num,
                                   block_n=block_n))
    out = jax.block_until_ready(fn(x, params))

    ref = physics_attention_reference(x, params, heads=heads, dim_head=dim_head,
                                      slice_num=slice_num)
    assert out.shape == (B, N, dim), out.shape
    # bf16 MXU operands (x, sw, M, group sums) + approx reciprocals -> bf16-level tol.
    assert jnp.allclose(out, ref, rtol=2e-2, atol=2e-2), \
        float(jnp.max(jnp.abs(out - ref)))
    print("KERNEL_OK")
</pallas_src>

<mosaic_0001>
module attributes {stable_mosaic.version = 11 : i64} {
  func.func @_slice_kernel(%arg0: i32, %arg1: i32, %arg2: i32, %arg3: memref<1x64x64xbf16, #tpu.memory_space<vmem>>, %arg4: memref<128x64xbf16, #tpu.memory_space<vmem>>, %arg5: memref<1x128xf32, #tpu.memory_space<vmem>>, %arg6: memref<64x128xbf16, #tpu.memory_space<vmem>>, %arg7: memref<1x128xf32, #tpu.memory_space<vmem>>, %arg8: memref<128x128xbf16, #tpu.memory_space<vmem>>, %arg9: memref<32x96xf32, #tpu.memory_space<vmem>>, %arg10: memref<64x64xf32, #tpu.memory_space<vmem>>, %arg11: memref<1x64x128xbf16, #tpu.memory_space<vmem>>, %arg12: memref<1x128x64xbf16, #tpu.memory_space<vmem>>, %arg13: memref<64x128xf32, #tpu.memory_space<vmem>>, %arg14: memref<1x128xf32, #tpu.memory_space<vmem>>) attributes {dimension_semantics = [#tpu.dimension_semantics<parallel>, #tpu.dimension_semantics<parallel>, #tpu.dimension_semantics<arbitrary>], iteration_bounds = array<i64: 2, 2, 4>, scalar_prefetch = 0 : i64, scratch_operands = 2 : i64, tpu.core_type = #tpu.core_type<tc>, window_params = [{transform_indices = @transform_0, window_bounds = array<i64: 1, 64, 64>}, {transform_indices = @transform_1, window_bounds = array<i64: 128, 64>}, {transform_indices = @transform_2, window_bounds = array<i64: 1, 128>}, {transform_indices = @transform_3, window_bounds = array<i64: 64, 128>}, {transform_indices = @transform_4, window_bounds = array<i64: 1, 128>}, {pipeline_mode = #tpu.pipeline_mode<synchronous>, transform_indices = @transform_5, window_bounds = array<i64: 128, 128>}, {pipeline_mode = #tpu.pipeline_mode<synchronous>, transform_indices = @transform_6, window_bounds = array<i64: 32, 96>}, {transform_indices = @transform_7, window_bounds = array<i64: 64, 64>}, {transform_indices = @transform_8, window_bounds = array<i64: 1, 64, 128>}, {transform_indices = @transform_9, window_bounds = array<i64: 1, 128, 64>}]} {
    %c0_i32 = arith.constant 0 : i32
    %0 = arith.cmpi eq, %arg2, %c0_i32 : i32
    %1 = arith.extui %0 : i1 to i32
    %c0_i32_0 = arith.constant 0 : i32
    %2 = arith.cmpi ne, %1, %c0_i32_0 : i32
    scf.if %2 {
      %cst_30 = arith.constant 0.000000e+00 : f32
      %45 = vector.broadcast %cst_30 : f32 to vector<64x128xf32>
      %c0_31 = arith.constant 0 : index
      %c0_32 = arith.constant 0 : index
      %46 = vector.load %arg13[%c0_31, %c0_32] : memref<64x128xf32, #tpu.memory_space<vmem>>, vector<64x128xf32>
      tpu.vector_store %arg13[%c0_31, %c0_32], %45 {strides = array<i32>} : memref<64x128xf32, #tpu.memory_space<vmem>>, vector<64x128xf32>,
      %cst_33 = arith.constant 0.000000e+00 : f32
      %47 = vector.broadcast %cst_33 : f32 to vector<1x128xf32>
      %c0_34 = arith.constant 0 : index
      %c0_35 = arith.constant 0 : index
      %48 = vector.load %arg14[%c0_34, %c0_35] : memref<1x128xf32, #tpu.memory_space<vmem>>, vector<1x128xf32>
      tpu.vector_store %arg14[%c0_34, %c0_35], %47 {strides = array<i32>} : memref<1x128xf32, #tpu.memory_space<vmem>>, vector<1x128xf32>,
    } else {
    }
    %c0 = arith.constant 0 : index
    %c0_1 = arith.constant 0 : index
    %c0_2 = arith.constant 0 : index
    %3 = vector.load %arg3[%c0, %c0_1, %c0_2] : memref<1x64x64xbf16, #tpu.memory_space<vmem>>, vector<1x64x64xbf16>
    %4 = vector.shape_cast %3 : vector<1x64x64xbf16> to vector<64x64xbf16>
    %c0_3 = arith.constant 0 : index
    %c0_4 = arith.constant 0 : index
    %5 = vector.load %arg4[%c0_3, %c0_4] : memref<128x64xbf16, #tpu.memory_space<vmem>>, vector<128x64xbf16>
    %cst = arith.constant dense<0.000000e+00> : vector<64x128xf32>
    %6 = tpu.matmul %4, %5, %cst {dimension_numbers = #tpu.dot_dimension_numbers<[1], [1], [0], [0], [0, 0, 1, 0], [], []>} : vector<64x64xbf16>, vector<128x64xbf16>, vector<64x128xf32> -> vector<64x128xf32>
    %c0_5 = arith.constant 0 : index
    %c0_6 = arith.constant 0 : index
    %7 = vector.load %arg5[%c0_5, %c0_6] : memref<1x128xf32, #tpu.memory_space<vmem>>, vector<1x128xf32>
    %8 = vector.broadcast %7 : vector<1x128xf32> to vector<64x128xf32>
    %9 = arith.addf %6, %8 : vector<64x128xf32>
    %10 = vector.extract_strided_slice %9 {offsets = [0, 0], sizes = [64, 64], strides = [1, 1]} : vector<64x128xf32> to vector<64x64xf32>
    %11 = arith.truncf %10 : vector<64x64xf32> to vector<64x64xbf16>
    %12 = vector.extract_strided_slice %9 {offsets = [0, 64], sizes = [64, 64], strides = [1, 1]} : vector<64x128xf32> to vector<64x64xf32>
    %13 = arith.truncf %12 : vector<64x64xf32> to vector<64x64xbf16>
    %c0_7 = arith.constant 0 : index
    %c0_8 = arith.constant 0 : index
    %14 = vector.load %arg6[%c0_7, %c0_8] : memref<64x128xbf16, #tpu.memory_space<vmem>>, vector<64x128xbf16>
    %cst_9 = arith.constant dense<0.000000e+00> : vector<64x128xf32>
    %15 = tpu.matmul %13, %14, %cst_9 {dimension_numbers = #tpu.dot_dimension_numbers<[1], [0], [0], [1], [0, 0, 1, 1], [], []>} : vector<64x64xbf16>, vector<64x128xbf16>, vector<64x128xf32> -> vector<64x128xf32>
    %c0_10 = arith.constant 0 : index
    %c0_11 = arith.constant 0 : index
    %16 = vector.load %arg7[%c0_10, %c0_11] : memref<1x128xf32, #tpu.memory_space<vmem>>, vector<1x128xf32>
    %17 = vector.broadcast %16 : vector<1x128xf32> to vector<64x128xf32>
    %18 = arith.addf %15, %17 : vector<64x128xf32>
    %cst_12 = arith.constant dense<0xFF800000> : vector<64xf32>
    %19 = vector.multi_reduction <maximumf>, %18, %cst_12 [1] : vector<64x128xf32> to vector<64xf32>
    %20 = vector.shape_cast %19 : vector<64xf32> to vector<64x1xf32>
    %21 = vector.broadcast %20 : vector<64x1xf32> to vector<64x128xf32>
    %22 = arith.subf %18, %21 : vector<64x128xf32>
    %23 = math.exp %22 : vector<64x128xf32>
    %24 = arith.truncf %23 : vector<64x128xf32> to vector<64x128xbf16>
    %c0_13 = arith.constant 0 : index
    %c0_14 = arith.constant 0 : index
    %25 = vector.load %arg8[%c0_13, %c0_14] : memref<128x128xbf16, #tpu.memory_space<vmem>>, vector<128x128xbf16>
    %cst_15 = arith.constant dense<0.000000e+00> : vector<64x128xf32>
    %26 = tpu.matmul %24, %25, %cst_15 {dimension_numbers = #tpu.dot_dimension_numbers<[1], [0], [0], [1], [0, 0, 1, 1], [], []>} : vector<64x128xbf16>, vector<128x128xbf16>, vector<64x128xf32> -> vector<64x128xf32>
    %27 = tpu.reciprocal %26 {approx = true} : vector<64x128xf32> -> vector<64x128xf32>
    %28 = arith.mulf %23, %27 : vector<64x128xf32>
    %29 = arith.truncf %28 : vector<64x128xf32> to vector<64x128xbf16>
    %c0_16 = arith.constant 0 : index
    %c0_17 = arith.constant 0 : index
    %c0_18 = arith.constant 0 : index
    %30 = vector.load %arg11[%c0_16, %c0_17, %c0_18] : memref<1x64x128xbf16, #tpu.memory_space<vmem>>, vector<1x64x128xbf16>
    %31 = vector.shape_cast %30 : vector<1x64x128xbf16> to vector<64x128xbf16>
    %32 = vector.shape_cast %29 : vector<64x128xbf16> to vector<1x64x128xbf16>
    tpu.vector_store %arg11[%c0_16, %c0_17, %c0_18], %32 {strides = array<i32>} : memref<1x64x128xbf16, #tpu.memory_space<vmem>>, vector<1x64x128xbf16>,
    %c0_19 = arith.constant 0 : index
    %c0_20 = arith.constant 0 : index
    %33 = vector.load %arg13[%c0_19, %c0_20] : memref<64x128xf32, #tpu.memory_space<vmem>>, vector<64x128xf32>
    %cst_21 = arith.constant dense<0.000000e+00> : vector<64x128xf32>
    %34 = tpu.matmul %11, %29, %cst_21 {dimension_numbers = #tpu.dot_dimension_numbers<[0], [0], [1], [1], [0, 1, 1, 1], [], []>} : vector<64x64xbf16>, vector<64x128xbf16>, vector<64x128xf32> -> vector<64x128xf32>
    %35 = arith.addf %33, %34 : vector<64x128xf32>
    %c0_22 = arith.constant 0 : index
    %c0_23 = arith.constant 0 : index
    %36 = vector.load %arg13[%c0_22, %c0_23] : memref<64x128xf32, #tpu.memory_space<vmem>>, vector<64x128xf32>
    tpu.vector_store %arg13[%c0_22, %c0_23], %35 {strides = array<i32>} : memref<64x128xf32, #tpu.memory_space<vmem>>, vector<64x128xf32>,
    %c0_24 = arith.constant 0 : index
    %c0_25 = arith.constant 0 : index
    %37 = vector.load %arg14[%c0_24, %c0_25] : memref<1x128xf32, #tpu.memory_space<vmem>>, vector<1x128xf32>
    %cst_26 = arith.constant dense<0.000000e+00> : vector<128xf32>
    %38 = vector.multi_reduction <add>, %28, %cst_26 [0] : vector<64x128xf32> to vector<128xf32>
    %39 = vector.shape_cast %38 : vector<128xf32> to vector<1x128xf32>
    %40 = arith.addf %37, %39 : vector<1x128xf32>
    %c0_27 = arith.constant 0 : index
    %c0_28 = arith.constant 0 : index
    %41 = vector.load %arg14[%c0_27, %c0_28] : memref<1x128xf32, #tpu.memory_space<vmem>>, vector<1x128xf32>
    tpu.vector_store %arg14[%c0_27, %c0_28], %40 {strides = array<i32>} : memref<1x128xf32, #tpu.memory_space<vmem>>, vector<1x128xf32>,
    %c3_i32 = arith.constant 3 : i32
    %42 = arith.cmpi eq, %arg2, %c3_i32 : i32
    %43 = arith.extui %42 : i1 to i32
    %c0_i32_29 = arith.constant 0 : i32
    %44 = arith.cmpi ne, %43, %c0_i32_29 : i32
    scf.if %44 {
      %c0_30 = arith.constant 0 : index
      %c0_31 = arith.constant 0 : index
      %45 = vector.load %arg14[%c0_30, %c0_31] : memref<1x128xf32, #tpu.memory_space<vmem>>, vector<1x128xf32>
      %cst_32 = arith.constant 9.99999974E-6 : f32
      %46 = vector.broadcast %cst_32 : f32 to vector<1x128xf32>
      %47 = arith.addf %45, %46 : vector<1x128xf32>
      %48 = tpu.reciprocal %47 {approx = true} : vector<1x128xf32> -> vector<1x128xf32>
      %c0_33 = arith.constant 0 : index
      %c0_34 = arith.constant 0 : index
      %49 = vector.load %arg10[%c0_33, %c0_34] : memref<64x64xf32, #tpu.memory_space<vmem>>, vector<64x64xf32>
      %c0_35 = arith.constant 0 : index
      %c0_36 = arith.constant 0 : index
      %50 = vector.load %arg13[%c0_35, %c0_36] : memref<64x128xf32, #tpu.memory_space<vmem>>, vector<32x64xf32>
      %51 = vector.extract_strided_slice %48 {offsets = [0, 0], sizes = [1, 64], strides = [1, 1]} : vector<1x128xf32> to vector<1x64xf32>
      %52 = vector.broadcast %51 : vector<1x64xf32> to vector<32x64xf32>
      %53 = arith.mulf %50, %52 : vector<32x64xf32>
      %c0_37 = arith.constant 0 : index
      %c0_38 = arith.constant 0 : index
      %54 = vector.load %arg9[%c0_37, %c0_38] : memref<32x96xf32, #tpu.memory_space<vmem>>, vector<32x96xf32>
      %cst_39 = arith.constant dense<0.000000e+00> : vector<64x96xf32>
      %55 = tpu.matmul %53, %54, %cst_39 {dimension_numbers = #tpu.dot_dimension_numbers<[0], [0], [1], [1], [0, 1, 1, 1], [], []>} : vector<32x64xf32>, vector<32x96xf32>, vector<64x96xf32> -> vector<64x96xf32>
      %56 = vector.extract_strided_slice %55 {offsets = [0, 0], sizes = [64, 32], strides = [1, 1]} : vector<64x96xf32> to vector<64x32xf32>
      %57 = vector.extract_strided_slice %55 {offsets = [0, 32], sizes = [64, 32], strides = [1, 1]} : vector<64x96xf32> to vector<64x32xf32>
      %58 = vector.extract_strided_slice %55 {offsets = [0, 64], sizes = [64, 32], strides = [1, 1]} : vector<64x96xf32> to vector<64x32xf32>
      %cst_40 = arith.constant dense<0.000000e+00> : vector<64x64xf32>
      %59 = tpu.matmul %56, %57, %cst_40 {dimension_numbers = #tpu.dot_dimension_numbers<[1], [1], [0], [0], [0, 0, 1, 0], [], []>} : vector<64x32xf32>, vector<64x32xf32>, vector<64x64xf32> -> vector<64x64xf32>
      %cst_41 = arith.constant 0.176776692 : f32
      %60 = vector.broadcast %cst_41 : f32 to vector<64x64xf32>
      %61 = arith.mulf %59, %60 : vector<64x64xf32>
      %cst_42 = arith.constant dense<0xFF800000> : vector<64xf32>
      %62 = vector.multi_reduction <maximumf>, %61, %cst_42 [1] : vector<64x64xf32> to vector<64xf32>
      %63 = vector.shape_cast %62 : vector<64xf32> to vector<64x1xf32>
      %64 = vector.broadcast %63 : vector<64x1xf32> to vector<64x64xf32>
      %65 = arith.subf %61, %64 : vector<64x64xf32>
      %66 = math.exp %65 : vector<64x64xf32>
      %cst_43 = arith.constant dense<0.000000e+00> : vector<64xf32>
      %67 = vector.multi_reduction <add>, %66, %cst_43 [1] : vector<64x64xf32> to vector<64xf32>
      %68 = vector.shape_cast %67 : vector<64xf32> to vector<64x1xf32>
      %69 = tpu.reciprocal %68 {approx = true} : vector<64x1xf32> -> vector<64x1xf32>
      %70 = vector.broadcast %69 : vector<64x1xf32> to vector<64x64xf32>
      %71 = arith.mulf %66, %70 : vector<64x64xf32>
      %cst_44 = arith.constant dense<0.000000e+00> : vector<64x32xf32>
      %72 = tpu.matmul %71, %58, %cst_44 {dimension_numbers = #tpu.dot_dimension_numbers<[1], [0], [0], [1], [0, 0, 1, 1], [], []>} : vector<64x64xf32>, vector<64x32xf32>, vector<64x32xf32> -> vector<64x32xf32>
      %73 = vector.extract_strided_slice %49 {offsets = [0, 0], sizes = [32, 64], strides = [1, 1]} : vector<64x64xf32> to vector<32x64xf32>
      %cst_45 = arith.constant dense<0.000000e+00> : vector<64x64xf32>
      %74 = tpu.matmul %72, %73, %cst_45 {dimension_numbers = #tpu.dot_dimension_numbers<[1], [0], [0], [1], [0, 0, 1, 1], [], []>} : vector<64x32xf32>, vector<32x64xf32>, vector<64x64xf32> -> vector<64x64xf32>
      %75 = arith.truncf %74 : vector<64x64xf32> to vector<64x64xbf16>
      %c0_46 = arith.constant 0 : index
      %c0_47 = arith.constant 0 : index
      %c0_48 = arith.constant 0 : index
      %76 = vector.load %arg12[%c0_46, %c0_47, %c0_48] : memref<1x128x64xbf16, #tpu.memory_space<vmem>>, vector<1x64x64xbf16>
      %77 = vector.shape_cast %76 : vector<1x64x64xbf16> to vector<64x64xbf16>
      %78 = vector.shape_cast %75 : vector<64x64xbf16> to vector<1x64x64xbf16>
      tpu.vector_store %arg12[%c0_46, %c0_47, %c0_48], %78 {strides = array<i32>} : memref<1x128x64xbf16, #tpu.memory_space<vmem>>, vector<1x64x64xbf16>,
      %c32 = arith.constant 32 : index
      %c64 = arith.constant 64 : index
      %79 = vector.load %arg13[%c32, %c64] : memref<64x128xf32, #tpu.memory_space<vmem>>, vector<32x64xf32>
      %80 = vector.extract_strided_slice %48 {offsets = [0, 64], sizes = [1, 64], strides = [1, 1]} : vector<1x128xf32> to vector<1x64xf32>
      %81 = vector.broadcast %80 : vector<1x64xf32> to vector<32x64xf32>
      %82 = arith.mulf %79, %81 : vector<32x64xf32>
      %c0_49 = arith.constant 0 : index
      %c0_50 = arith.constant 0 : index
      %83 = vector.load %arg9[%c0_49, %c0_50] : memref<32x96xf32, #tpu.memory_space<vmem>>, vector<32x96xf32>
      %cst_51 = arith.constant dense<0.000000e+00> : vector<64x96xf32>
      %84 = tpu.matmul %82, %83, %cst_51 {dimension_numbers = #tpu.dot_dimension_numbers<[0], [0], [1], [1], [0, 1, 1, 1], [], []>} : vector<32x64xf32>, vector<32x96xf32>, vector<64x96xf32> -> vector<64x96xf32>
      %85 = vector.extract_strided_slice %84 {offsets = [0, 0], sizes = [64, 32], strides = [1, 1]} : vector<64x96xf32> to vector<64x32xf32>
      %86 = vector.extract_strided_slice %84 {offsets = [0, 32], sizes = [64, 32], strides = [1, 1]} : vector<64x96xf32> to vector<64x32xf32>
      %87 = vector.extract_strided_slice %84 {offsets = [0, 64], sizes = [64, 32], strides = [1, 1]} : vector<64x96xf32> to vector<64x32xf32>
      %cst_52 = arith.constant dense<0.000000e+00> : vector<64x64xf32>
      %88 = tpu.matmul %85, %86, %cst_52 {dimension_numbers = #tpu.dot_dimension_numbers<[1], [1], [0], [0], [0, 0, 1, 0], [], []>} : vector<64x32xf32>, vector<64x32xf32>, vector<64x64xf32> -> vector<64x64xf32>
      %cst_53 = arith.constant 0.176776692 : f32
      %89 = vector.broadcast %cst_53 : f32 to vector<64x64xf32>
      %90 = arith.mulf %88, %89 : vector<64x64xf32>
      %cst_54 = arith.constant dense<0xFF800000> : vector<64xf32>
      %91 = vector.multi_reduction <maximumf>, %90, %cst_54 [1] : vector<64x64xf32> to vector<64xf32>
      %92 = vector.shape_cast %91 : vector<64xf32> to vector<64x1xf32>
      %93 = vector.broadcast %92 : vector<64x1xf32> to vector<64x64xf32>
      %94 = arith.subf %90, %93 : vector<64x64xf32>
      %95 = math.exp %94 : vector<64x64xf32>
      %cst_55 = arith.constant dense<0.000000e+00> : vector<64xf32>
      %96 = vector.multi_reduction <add>, %95, %cst_55 [1] : vector<64x64xf32> to vector<64xf32>
      %97 = vector.shape_cast %96 : vector<64xf32> to vector<64x1xf32>
      %98 = tpu.reciprocal %97 {approx = true} : vector<64x1xf32> -> vector<64x1xf32>
      %99 = vector.broadcast %98 : vector<64x1xf32> to vector<64x64xf32>
      %100 = arith.mulf %95, %99 : vector<64x64xf32>
      %cst_56 = arith.constant dense<0.000000e+00> : vector<64x32xf32>
      %101 = tpu.matmul %100, %87, %cst_56 {dimension_numbers = #tpu.dot_dimension_numbers<[1], [0], [0], [1], [0, 0, 1, 1], [], []>} : vector<64x64xf32>, vector<64x32xf32>, vector<64x32xf32> -> vector<64x32xf32>
      %102 = vector.extract_strided_slice %49 {offsets = [32, 0], sizes = [32, 64], strides = [1, 1]} : vector<64x64xf32> to vector<32x64xf32>
      %cst_57 = arith.constant dense<0.000000e+00> : vector<64x64xf32>
      %103 = tpu.matmul %101, %102, %cst_57 {dimension_numbers = #tpu.dot_dimension_numbers<[1], [0], [0], [1], [0, 0, 1, 1], [], []>} : vector<64x32xf32>, vector<32x64xf32>, vector<64x64xf32> -> vector<64x64xf32>
      %104 = arith.truncf %103 : vector<64x64xf32> to vector<64x64xbf16>
      %c0_58 = arith.constant 0 : index
      %c64_59 = arith.constant 64 : index
      %c0_60 = arith.constant 0 : index
      %105 = vector.load %arg12[%c0_58, %c64_59, %c0_60] : memref<1x128x64xbf16, #tpu.memory_space<vmem>>, vector<1x64x64xbf16>
      %106 = vector.shape_cast %105 : vector<1x64x64xbf16> to vector<64x64xbf16>
      %107 = vector.shape_cast %104 : vector<64x64xbf16> to vector<1x64x64xbf16>
      tpu.vector_store %arg12[%c0_58, %c64_59, %c0_60], %107 {strides = array<i32>} : memref<1x128x64xbf16, #tpu.memory_space<vmem>>, vector<1x64x64xbf16>,
    } else {
    }
    return
  }
  func.func @transform_0(%arg0: i32, %arg1: i32, %arg2: i32) -> (i32, i32, i32) {
    %c0_i32 = arith.constant 0 : i32
    %c0_i32_0 = arith.constant 0 : i32
    return %arg0, %arg2, %c0_i32 : i32, i32, i32
  }
  func.func @transform_1(%arg0: i32, %arg1: i32, %arg2: i32) -> (i32, i32) {
    %c0_i32 = arith.constant 0 : i32
    %c0_i32_0 = arith.constant 0 : i32
    return %arg1, %c0_i32 : i32, i32
  }
  func.func @transform_2(%arg0: i32, %arg1: i32, %arg2: i32) -> (i32, i32) {
    %c0_i32 = arith.constant 0 : i32
    %c0_i32_0 = arith.constant 0 : i32
    return %c0_i32, %arg1 : i32, i32
  }
  func.func @transform_3(%arg0: i32, %arg1: i32, %arg2: i32) -> (i32, i32) {
    %c0_i32 = arith.constant 0 : i32
    return %arg1, %arg1 : i32, i32
  }
  func.func @transform_4(%arg0: i32, %arg1: i32, %arg2: i32) -> (i32, i32) {
    %c0_i32 = arith.constant 0 : i32
    %c0_i32_0 = arith.constant 0 : i32
    return %c0_i32, %arg1 : i32, i32
  }
  func.func @transform_5(%arg0: i32, %arg1: i32, %arg2: i32) -> (i32, i32) {
    %c0_i32 = arith.constant 0 : i32
    %c0_i32_0 = arith.constant 0 : i32
    %c0_i32_1 = arith.constant 0 : i32
    return %c0_i32, %c0_i32_0 : i32, i32
  }
  func.func @transform_6(%arg0: i32, %arg1: i32, %arg2: i32) -> (i32, i32) {
    %c0_i32 = arith.constant 0 : i32
    %c0_i32_0 = arith.constant 0 : i32
    %c0_i32_1 = arith.constant 0 : i32
    return %c0_i32, %c0_i32_0 : i32, i32
  }
  func.func @transform_7(%arg0: i32, %arg1: i32, %arg2: i32) -> (i32, i32) {
    %c0_i32 = arith.constant 0 : i32
    %c0_i32_0 = arith.constant 0 : i32
    return %arg1, %c0_i32 : i32, i32
  }
  func.func @transform_8(%arg0: i32, %arg1: i32, %arg2: i32) -> (i32, i32, i32) {
    %c0_i32 = arith.constant 0 : i32
    return %arg0, %arg2, %arg1 : i32, i32, i32
  }
  func.func @transform_9(%arg0: i32, %arg1: i32, %arg2: i32) -> (i32, i32, i32) {
    %c0_i32 = arith.constant 0 : i32
    %c0_i32_0 = arith.constant 0 : i32
    return %arg0, %arg1, %c0_i32 : i32, i32, i32
  }
}

module attributes {stable_mosaic.version = 11 : i64} {
  func.func @_deslice_kernel(%arg0: i32, %arg1: i32, %arg2: memref<1x64x256xbf16, #tpu.memory_space<vmem>>, %arg3: memref<1x256x64xbf16, #tpu.memory_space<vmem>>, %arg4: memref<1x64xf32, #tpu.memory_space<vmem>>, %arg5: memref<1x64x64xf32, #tpu.memory_space<vmem>>) attributes {dimension_semantics = [#tpu.dimension_semantics<parallel>, #tpu.dimension_semantics<parallel>], iteration_bounds = array<i64: 2, 4>, scalar_prefetch = 0 : i64, scratch_operands = 0 : i64, tpu.core_type = #tpu.core_type<tc>, window_params = [{transform_indices = @transform_0, window_bounds = array<i64: 1, 64, 256>}, {transform_indices = @transform_1, window_bounds = array<i64: 1, 256, 64>}, {pipeline_mode = #tpu.pipeline_mode<synchronous>, transform_indices = @transform_2, window_bounds = array<i64: 1, 64>}, {transform_indices = @transform_3, window_bounds = array<i64: 1, 64, 64>}]} {
    %c0 = arith.constant 0 : index
    %c0_0 = arith.constant 0 : index
    %c0_1 = arith.constant 0 : index
    %0 = vector.load %arg2[%c0, %c0_0, %c0_1] : memref<1x64x256xbf16, #tpu.memory_space<vmem>>, vector<1x64x256xbf16>
    %1 = vector.shape_cast %0 : vector<1x64x256xbf16> to vector<64x256xbf16>
    %c0_2 = arith.constant 0 : index
    %c0_3 = arith.constant 0 : index
    %c0_4 = arith.constant 0 : index
    %2 = vector.load %arg3[%c0_2, %c0_3, %c0_4] : memref<1x256x64xbf16, #tpu.memory_space<vmem>>, vector<1x256x64xbf16>
    %3 = vector.shape_cast %2 : vector<1x256x64xbf16> to vector<256x64xbf16>
    %cst = arith.constant dense<0.000000e+00> : vector<64x64xf32>
    %4 = tpu.matmul %1, %3, %cst {dimension_numbers = #tpu.dot_dimension_numbers<[1], [0], [0], [1], [0, 0, 1, 1], [], []>} : vector<64x256xbf16>, vector<256x64xbf16>, vector<64x64xf32> -> vector<64x64xf32>
    %c0_5 = arith.constant 0 : index
    %c0_6 = arith.constant 0 : index
    %5 = vector.load %arg4[%c0_5, %c0_6] : memref<1x64xf32, #tpu.memory_space<vmem>>, vector<1x64xf32>
    %6 = vector.broadcast %5 : vector<1x64xf32> to vector<64x64xf32>
    %7 = arith.addf %4, %6 : vector<64x64xf32>
    %c0_7 = arith.constant 0 : index
    %c0_8 = arith.constant 0 : index
    %c0_9 = arith.constant 0 : index
    %8 = vector.load %arg5[%c0_7, %c0_8, %c0_9] : memref<1x64x64xf32, #tpu.memory_space<vmem>>, vector<1x64x64xf32>
    %9 = vector.shape_cast %8 : vector<1x64x64xf32> to vector<64x64xf32>
    %10 = vector.shape_cast %7 : vector<64x64xf32> to vector<1x64x64xf32>
    tpu.vector_store %arg5[%c0_7, %c0_8, %c0_9], %10 {strides = array<i32>} : memref<1x64x64xf32, #tpu.memory_space<vmem>>, vector<1x64x64xf32>,
    return
  }
  func.func @transform_0(%arg0: i32, %arg1: i32) -> (i32, i32, i32) {
    %c0_i32 = arith.constant 0 : i32
    %c0_i32_0 = arith.constant 0 : i32
    return %arg0, %arg1, %c0_i32 : i32, i32, i32
  }
  func.func @transform_1(%arg0: i32, %arg1: i32) -> (i32, i32, i32) {
    %c0_i32 = arith.constant 0 : i32
    %c0_i32_0 = arith.constant 0 : i32
    %c0_i32_1 = arith.constant 0 : i32
    return %arg0, %c0_i32, %c0_i32_0 : i32, i32, i32
  }
  func.func @transform_2(%arg0: i32, %arg1: i32) -> (i32, i32) {
    %c0_i32 = arith.constant 0 : i32
    %c0_i32_0 = arith.constant 0 : i32
    %c0_i32_1 = arith.constant 0 : i32
    return %c0_i32, %c0_i32_0 : i32, i32
  }
  func.func @transform_3(%arg0: i32, %arg1: i32) -> (i32, i32, i32) {
    %c0_i32 = arith.constant 0 : i32
    %c0_i32_0 = arith.constant 0 : i32
    return %arg0, %arg1, %c0_i32 : i32, i32, i32
  }
}

</mosaic_0001>

<bundles_post_ra>
// kernel: physics_attention_pallas.3
= control target key start
LH: loop header
LB: loop body
LE: loop exit
PB: predicated region body
PF: predicated region fallthrough
CT: control target
= control target key end

     0   :  { %s822_s12 = smov 0   ;;  %s824_s13 = smov 0   ;;  %s928_s0 = inlined_call_operand.vmem [shape: bf16[2,256,256], index: 0, kind: input, shape index: {}]   ;;  %s929_s1 = inlined_call_operand.vmem [shape: bf16[2,256,64], index: 1, kind: input, shape index: {}]   ;;  %s930_s2 = inlined_call_operand.vmem [shape: f32[1,64], index: 2, kind: input, shape index: {}]   ;;  %s931_s3 = inlined_call_operand.vmem [shape: f32[2,256,64], index: 3, kind: output, shape index: {}]  }
   0x1   :  { %s826_s14 = smov 0   ;;  %s828_s15 = smov 0  }
   0x2   :  { %s830_s16 = smov 0  }
   0x3 LB: > { %s22_s17 = sadd.s32 1, %s792_s14  ;;  %s25_s18 = sadd.s32 1, %s796_s15  ;;  %s800_s16 = sphi %s830_s16, %s13_s16   ;;  %s796_s15 = sphi %s828_s15, %s935_s15   ;;  %s792_s14 = sphi %s826_s14, %s934_s14   ;;  %s788_s13 = sphi %s824_s13, %s933_s13   ;;  %s784_s12 = sphi %s822_s12, %s932_s12  }
   0x4   : > { %p23_p0 = scmp.ge.s32.totalorder %s22_s17, 4  ;;  %p600_p1 = scmp.ge.s32.totalorder %s800_s16, 1 }
   0x5   : > { %p169_p2 = scmp.lt.s32.totalorder %s800_s16, 9 }
   0x6   : > { %s937_s17 = smov (%p23_p0, %s22_s17), 0  ;;  %s939_s18 = smov (!%p23_p0, %s25_s18), %s796_s15 }
   0x7   : > { %p170_p3 = pnand %p600_p1, %p169_p2  ;;  %p27_p4 = scmp.ge.s32.totalorder %s939_s18, 2 }
   0x8   : > { %p208_p5 = scmp.lt.s32.totalorder (!%p170_p3), %s788_s13, 1  ;;  %s601_s19 = sshll.u32 (!%p170_p3), %s784_s12, 3  ;;  %v610_v26 = vld [vmem:[%s930_s2] ss:$0 sm:$0xff] (!%p170_p3)  ;;  %vm482_vm0 = vcmask (!%p170_p3), 523264  }
   0x9   : > { %s941_s18 = smov (%p27_p4, %s939_s18), 0  ;;  %173 = sbr.rel (%p170_p3) target bundleno = 280 (0x118), region = 32 }
   0xa   : > { %p210_p6 = scmp.lt.s32.totalorder (!%p170_p3), %s601_s19, 31 }
  0x10   : > { %s943_s13 = smov (!%p208_p5, %s788_s13), 1  ;;  %s945_s19 = smov (!%p210_p6, %s601_s19), 31 }
  0x11   : > { %s637_s20 = sshll.u32 %s943_s13, 7  ;;  %s608_s24 = sshll.u32 %s943_s13, 5 }
  0x12   : > { %s855_s23 = scalar_lea.vmem %s929_s1, %s637_s20  ;;  %s859_s25 = sadd.s32 %s608_s24, %s945_s19 }
  0x13   : > { %v734_v0 = vld [vmem:[%s855_s23 + $0x40] sm:$0xff]   ;;  %v736_v2 = vld [vmem:[%s855_s23 + $0x48] sm:$0xff]   ;;  %v738_v4 = vld [vmem:[%s855_s23 + $0x50] sm:$0xff]   ;;  %s602_s26 = sshll.u32 %s945_s19, 1  ;;  %s603_s27 = sshll.u32 %s943_s13, 6 }
  0x14   : > { %v735_v1 = vld [vmem:[%s855_s23] sm:$0xff]   ;;  %638 = vmatprep.subr.bf16.mxu0 %v734_v0  ;;  %678 = vmatprep.subr.bf16.mxu1 %v734_v0  ;;  %v737_v3 = vld [vmem:[%s855_s23 + $0x8] sm:$0xff]   ;;  %v739_v5 = vld [vmem:[%s855_s23 + $0x10] sm:$0xff]   ;;  %s214_s28 = sadd.s32 %s603_s27, %s602_s26  ;;  %s609_s6 = sshll.u32 %s859_s25, 3 }
  0x15   : > { %639 = vmatpush3.bf16.msra.mxu0 %v735_v1  ;;  %686 = vmatpush3.bf16.msra.mxu1 %v735_v1  ;;  %v740_v6 = vld [vmem:[%s855_s23 + $0x58] sm:$0xff]   ;;  %s604_s29 = sshll.u32 %s214_s28, 2  ;;  %v742_v8 = vld [vmem:[%s855_s23 + $0x60] sm:$0xff]   ;;  %v744_v10 = vld [vmem:[%s855_s23 + $0x68] sm:$0xff]   ;;  %s895_s11 = scalar_lea.vmem %s931_s3, %s609_s6 }
  0x16   : > { %640 = vmatprep.subr.bf16.mxu0 %v736_v2  ;;  %679 = vmatprep.subr.bf16.mxu1 %v736_v2  ;;  %v741_v7 = vld [vmem:[%s855_s23 + $0x18] sm:$0xff]   ;;  %s871_s5 = scalar_lea.vmem %s928_s0, %s604_s29  ;;  %v743_v9 = vld [vmem:[%s855_s23 + $0x20] sm:$0xff]   ;;  %v745_v13 = vld [vmem:[%s855_s23 + $0x28] sm:$0xff]  }
  0x17   : > { %v752_v11 = vld [vmem:[%s871_s5 + $0x4] ss:$8 sps:$4 sm:$0xff]   ;;  %v746_v14 = vld [vmem:[%s855_s23 + $0x70] sm:$0xff]   ;;  %v748_v16 = vld [vmem:[%s855_s23 + $0x78] sm:$0xff]  }
  0x18   : > { %v755_v12 = vld [vmem:[%s871_s5 + $0x24] ss:$8 sps:$4 sm:$0xff]   ;;  %449 = vmatprep.mubr.bf16.mxu0 %v752_v11  ;;  %v747_v15 = vld [vmem:[%s855_s23 + $0x30] sm:$0xff]   ;;  %v749_v17 = vld [vmem:[%s855_s23 + $0x38] sm:$0xff]  }
  0x19   : > { %641 = vmatpush3.bf16.msra.mxu0 %v737_v3  ;;  %687 = vmatpush3.bf16.msra.mxu1 %v737_v3  ;;  %v750_v18 = vld [vmem:[%s871_s5] ss:$8 sps:$4 sm:$0xff]   ;;  %v756_v20 = vld [vmem:[%s871_s5 + $0x14] ss:$8 sps:$4 sm:$0xff]   ;;  %v760_v22 = vld [vmem:[%s871_s5 + $0x10] ss:$8 sps:$4 sm:$0xff]  }
  0x1a   : > { %642 = vmatprep.subr.bf16.mxu0 %v738_v4  ;;  %680 = vmatprep.subr.bf16.mxu1 %v738_v4  ;;  %v753_v19 = vld [vmem:[%s871_s5 + $0x20] ss:$8 sps:$4 sm:$0xff]   ;;  %v758_v21 = vld [vmem:[%s871_s5 + $0x34] ss:$8 sps:$4 sm:$0xff]   ;;  %v761_v23 = vld [vmem:[%s871_s5 + $0x30] ss:$8 sps:$4 sm:$0xff]  }
  0x1b   : > { %465 = vmatprep.mubr.bf16.mxu1 %v755_v12 }
  0x1d   : > { %643 = vmatpush3.bf16.msra.mxu0 %v739_v5  ;;  %688 = vmatpush3.bf16.msra.mxu1 %v739_v5 }
  0x1e   : > { %644 = vmatprep.subr.bf16.mxu0 %v740_v6  ;;  %681 = vmatprep.subr.bf16.mxu1 %v740_v6 }
  0x21   : > { %645 = vmatpush3.bf16.msra.mxu0 %v741_v7  ;;  %689 = vmatpush3.bf16.msra.mxu1 %v741_v7 }
  0x22   : > { %646 = vmatprep.subr.bf16.mxu0 %v742_v8  ;;  %682 = vmatprep.subr.bf16.mxu1 %v742_v8 }
  0x25   : > { %647 = vmatpush3.bf16.msra.mxu0 %v743_v9  ;;  %690 = vmatpush3.bf16.msra.mxu1 %v743_v9 }
  0x26   : > { %648 = vmatprep.subr.bf16.mxu0 %v744_v10  ;;  %683 = vmatprep.subr.bf16.mxu1 %v744_v10 }
  0x29   : > { %649 = vmatpush3.bf16.msra.mxu0 %v745_v13  ;;  %691 = vmatpush3.bf16.msra.mxu1 %v745_v13 }
  0x2a   : > { %650 = vmatprep.subr.bf16.mxu0 %v746_v14  ;;  %684 = vmatprep.subr.bf16.mxu1 %v746_v14 }
  0x2d   : > { %651 = vmatpush3.bf16.msra.mxu0 %v747_v15  ;;  %692 = vmatpush3.bf16.msra.mxu1 %v747_v15 }
  0x2e   : > { %652 = vmatprep.subr.bf16.mxu0 %v748_v16  ;;  %685 = vmatprep.subr.bf16.mxu1 %v748_v16 }
  0x31   : > { %653 = vmatpush3.bf16.msra.mxu0 %v749_v17  ;;  %693 = vmatpush3.bf16.msra.mxu1 %v749_v17 }
  0x34   : > { %450 = vmatmul.mubr.bf16.vlgmr.msra.gmra.mrb[0].mxu0 %v750_v18  ;;  %466 = vmatmul.mubr.bf16.vlgmr.msra.gmra.mrb[0].mxu1 %v753_v19 }
  0x35   : > { %457 = vmatprep.mubr.bf16.mxu0 %v756_v20  ;;  %473 = vmatprep.mubr.bf16.mxu1 %v758_v21 }
  0x3c   : > { %458 = vmatmul.mubr.bf16.gmra.mrb[4].mxu0 %v760_v22  ;;  %474 = vmatmul.mubr.bf16.gmra.mrb[4].mxu1 %v761_v23 }
 0x107   : > { %v654_v24 = vpop.f32.mrb[0].mxu0  ;;  %v666_v25 = vpop.f32.mrb[0].mxu1 }
 0x108   : > { %v655_v27 = vpop.f32.mrb[1].mxu0  ;;  %v667_v28 = vpop.f32.mrb[1].mxu1 }
 0x109   : > { %v656_v29 = vadd.f32 %v655_v27, %v654_v24  ;;  %v668_v30 = vadd.f32 %v667_v28, %v666_v25  ;;  %v657_v31 = vpop.f32.mrb[2].mxu0  ;;  %v669_v32 = vpop.f32.mrb[2].mxu1 }
 0x10a   : > { %v658_v33 = vpop.f32.mrb[3].mxu0  ;;  %v670_v34 = vpop.f32.mrb[3].mxu1 }
 0x10b   : > { %v452_v35 = vadd.f32 %v656_v29, %v610_v26  ;;  %v468_v36 = vadd.f32 %v668_v30, %v610_v26  ;;  %v659_v37 = vadd.f32 %v658_v33, %v657_v31  ;;  %v671_v38 = vadd.f32 %v670_v34, %v669_v32 }
 0x10d   : > { %483 = vst.msk [vmem:[%s895_s11] sm:$0xff] %vm482_vm0, %v452_v35  ;;  %487 = vst.msk [vmem:[%s895_s11 + $0x20] sm:$0xff] %vm482_vm0, %v468_v36  ;;  %v455_v39 = vadd.f32 %v659_v37, %v610_v26  ;;  %v471_v40 = vadd.f32 %v671_v38, %v610_v26 }
 0x10f   : > { %484 = vst.msk [vmem:[%s895_s11 + $0x8] sm:$0xff] %vm482_vm0, %v455_v39  ;;  %488 = vst.msk [vmem:[%s895_s11 + $0x28] sm:$0xff] %vm482_vm0, %v471_v40  ;;  %v660_v41 = vpop.f32.mrb[4].mxu0  ;;  %v672_v42 = vpop.f32.mrb[4].mxu1 }
 0x110   : > { %v661_v43 = vpop.f32.mrb[5].mxu0  ;;  %v673_v44 = vpop.f32.mrb[5].mxu1 }
 0x111   : > { %v662_v45 = vadd.f32 %v661_v43, %v660_v41  ;;  %v674_v46 = vadd.f32 %v673_v44, %v672_v42  ;;  %v663_v47 = vpop.f32.mrb[6].mxu0  ;;  %v675_v48 = vpop.f32.mrb[6].mxu1 }
 0x112   : > { %v664_v49 = vpop.f32.mrb[7].mxu0  ;;  %v676_v50 = vpop.f32.mrb[7].mxu1 }
 0x113   : > { %v460_v51 = vadd.f32 %v662_v45, %v610_v26  ;;  %v476_v52 = vadd.f32 %v674_v46, %v610_v26  ;;  %v665_v53 = vadd.f32 %v664_v49, %v663_v47  ;;  %v677_v54 = vadd.f32 %v676_v50, %v675_v48 }
 0x115   : > { %485 = vst.msk [vmem:[%s895_s11 + $0x10] sm:$0xff] %vm482_vm0, %v460_v51  ;;  %489 = vst.msk [vmem:[%s895_s11 + $0x30] sm:$0xff] %vm482_vm0, %v476_v52  ;;  %v463_v55 = vadd.f32 %v665_v53, %v610_v26  ;;  %v479_v56 = vadd.f32 %v677_v54, %v610_v26 }
 0x117   : > { %486 = vst.msk [vmem:[%s895_s11 + $0x18] sm:$0xff] %vm482_vm0, %v463_v55  ;;  %490 = vst.msk [vmem:[%s895_s11 + $0x38] sm:$0xff] %vm482_vm0, %v479_v56 }
 0x118 PF: > { %s13_s16 = sadd.s32 1, %s800_s16   ;;  %s932_s12 = smov %s792_s14 }
 0x119   : > { %p10_p7 = scmp.ge.s32.totalorder %s13_s16, 10   ;;  %s933_s13 = smov %s796_s15 }
 0x11a   : > { %s934_s14 = smov %s937_s17  ;;  %s935_s15 = smov %s941_s18 }
 0x11b   :  { %12 = sbr.rel (!%p10_p7) target bundleno = 3 (0x3), region = 65 }

// kernel: physics_attention_pallas.2
= control target key start
LH: loop header
LB: loop body
LE: loop exit
PB: predicated region body
PF: predicated region fallthrough
CT: control target
= control target key end

     0   :  { %s4901_s0 = inlined_call_operand.vmem [shape: bf16[2,256,64], index: 0, kind: input, shape index: {}]   ;;  %s4902_s1 = inlined_call_operand.vmem [shape: bf16[256,64], index: 1, kind: input, shape index: {}]   ;;  %s4903_s2 = inlined_call_operand.vmem [shape: f32[1,256], index: 2, kind: input, shape index: {}]   ;;  %s4904_s3 = inlined_call_operand.vmem [shape: bf16[128,256], index: 3, kind: input, shape index: {}]   ;;  %s4905_s4 = inlined_call_operand.vmem [shape: f32[1,256], index: 4, kind: input, shape index: {}]   ;;  %s4906_s5 = inlined_call_operand.vmem [shape: bf16[128,128], index: 5, kind: input, shape index: {}]   ;;  %s4907_s6 = inlined_call_operand.vmem [shape: f32[32,96], index: 6, kind: input, shape index: {}]   ;;  %s4908_s7 = inlined_call_operand.vmem [shape: f32[128,64], index: 7, kind: input, shape index: {}]   ;;  %s4909_s8 = inlined_call_operand.vmem [shape: bf16[2,256,256], index: 8, kind: output, shape index: {0}]   ;;  %s4910_s9 = inlined_call_operand.vmem [shape: bf16[2,256,64], index: 9, kind: output, shape index: {1}]  }
   0x1   :  { %4922 = sst [smem:[#allocation17_spill]] %s4901_s0 }
   0x2   :  { %4923 = sst [smem:[#allocation18_spill]] %s4904_s3 }
   0x3   :  { %4924 = sst [smem:[#allocation19_spill]] %s4906_s5 }
   0x4   :  { %4925 = sst [smem:[#allocation20_spill]] %s4907_s6 }
   0x5   :  { %4926 = sst [smem:[#allocation21_spill]] %s4909_s8 }
   0x6   :  { %s4284_s30 = smov 0   ;;  %s4286_s10 = smov 0  }
   0x7   :  { %s4288_s11 = smov 0   ;;  %s4290_s12 = smov 0  }
   0x8   :  { %s4292_s13 = smov 0   ;;  %s4294_s14 = smov 0  }
   0x9   :  { %s4296_s15 = smov 0   ;;  %s4298_s16 = smov 0  }
   0xa   :  { %s4300_s17 = smov 0   ;;  %s4302_s18 = smov 0  }
   0xb   :  { %s4304_s19 = smov 0  }
   0xc LB: > { %4927 = sst [smem:[#allocation6_spill]] %s4192_s10  ;;  %s32_s20 = sadd.s32 1, %s4216_s16  ;;  %s4228_s19 = sphi %s4304_s19, %s20_s19   ;;  %s4224_s18 = sphi %s4302_s18, %s4958_s18   ;;  %s4220_s17 = sphi %s4300_s17, %s4957_s17   ;;  %s4216_s16 = sphi %s4298_s16, %s4956_s16   ;;  %s4212_s15 = sphi %s4296_s15, %s4955_s15   ;;  %s4208_s14 = sphi %s4294_s14, %s4954_s14   ;;  %s4204_s13 = sphi %s4292_s13, %s4953_s13   ;;  %s4200_s12 = sphi %s4290_s12, %s4952_s12   ;;  %s4196_s11 = sphi %s4288_s11, %s4951_s11   ;;  %s4192_s10 = sphi %s4286_s10, %s4950_s10   ;;  %s4188_s30 = sphi %s4284_s30, %s4949_s30  }
   0xd   : > { %4928 = sst [smem:[#allocation7_spill]] %s4200_s12  ;;  %p33_p0 = scmp.ge.s32.totalorder %s32_s20, 4 }
   0xe   : > { %4929 = sst [smem:[#allocation8_spill]] %s4216_s16  ;;  %s35_s21 = sadd.s32 1, %s4220_s17 }
   0xf   : > { %4930 = sst [smem:[#allocation9_spill]] %s4220_s17  ;;  %s3073_s22 = sadd.s32 4294967295, %s4228_s19  }
  0x10   : > { %4931 = sst [smem:[#allocation10_spill]] %s4224_s18  ;;  %s39_s23 = sadd.s32 1, %s4224_s18 }
  0x11   : > { %4932 = sst [smem:[#allocation11_spill]] %s4228_s19  ;;  %s4960_s20 = smov (%p33_p0, %s32_s20), 0 }
  0x12   : > { %4933 = sst [smem:[#allocation12_spill]] %s4960_s20  ;;  %s4962_s21 = smov (!%p33_p0, %s35_s21), %s4220_s17 }
  0x13   : > { %p135_p1 = scmp.ne.s32.totalorder %s4200_s12, %s4196_s11  ;;  %p136_p2 = scmp.eq.s32.totalorder %s4228_s19, 0 }
  0x14   : > { %p37_p3 = scmp.ge.s32.totalorder %s4962_s21, 2  ;;  %s128_s24 = sadd.s32 1, %s4200_s12 }
  0x15   : > { %p4350_p4 = por %p136_p2, %p135_p1  ;;  %s246_s26 = ssub.s32 %s4216_s16, %s4960_s20 }
  0x16   : > { %s4964_s21 = smov (%p37_p3, %s4962_s21), 0  ;;  %s4966_s23 = smov (!%p37_p3, %s39_s23), %s4224_s18 }
  0x17   : > { %4935 = sst [smem:[#allocation13_spill]] %s4964_s21  ;;  %s123_s27 = ssub.s32 %s4220_s17, %s4964_s21 }
  0x18   : > { %p262_p5 = scmp.ne.s32.totalorder %s4192_s10, %s4188_s30  ;;  %p41_p6 = scmp.ge.s32.totalorder %s4966_s23, 2 }
  0x19   : > { %s125_s28 = sor.u32 %s123_s27, %s123_s27  ;;  %p263_p8 = scmp.eq.s32.totalorder %s3073_s22, 15 }
  0x1a   : > { %p126_p7 = scmp.eq.s32.totalorder %s125_s28, 0  ;;  %s4968_s23 = smov (%p41_p6, %s4966_s23), 0 }
  0x1b   : > { %4936 = sst [smem:[#allocation14_spill]] %s4968_s23  ;;  %s245_s8 = ssub.s32 %s4224_s18, %s4968_s23 }
  0x1c   : > { %s4366_s29 = scalar_select %p126_p7, %s4200_s12, %s128_s24  }
  0x1d   : > { %p4370_p9 = por %p263_p8, %p262_p5  ;;  %s247_s20 = sor.u32 %s246_s26, %s245_s8 }
  0x1e   : > { %4937 = sst [smem:[#allocation15_spill]] %s4366_s29  ;;  %s249_s16 = sor.u32 %s247_s20, %s123_s27 }
  0x1f   : > { %s252_s5 = sadd.s32 1, %s4192_s10  ;;  %p250_p10 = scmp.eq.s32.totalorder %s249_s16, 0 }
  0x20   : > { %p3076_p11 = scmp.ge.s32.totalorder %s4228_s19, 16 }
  0x21   : > { %s4376_s21 = scalar_select %p250_p10, %s4192_s10, %s252_s5  }
  0x22   : > { %319 = sbr.rel (%p3076_p11) target bundleno = 56 (0x38), region = 24 }
  0x23   : > { %4939 = sst [smem:[#allocation16_spill]] %s4376_s21 }
  0x29   : > { %350 = sbr.rel (!%p4350_p4) target bundleno = 56 (0x38), region = 40  ;;  %s352_s22 = sand.u32 (%p4350_p4), 1, %s4200_s12  }
  0x2a   : > { %s3245_s24 = sshll.u32 (%p4350_p4), %s4220_s17, 4  ;;  %s3077_s28 = sshll.u32 (%p4350_p4), %s352_s22, 5 }
  0x2b   : > { %s357_s23 = sadd.s32 (%p4350_p4), %s4220_s17, %s3245_s24  ;;  %s4940_s3 = sld [smem:[#allocation18_spill]] (%p4350_p4) }
  0x2c   : > { %s3080_s18 = sshll.u32 (%p4350_p4), %s357_s23, 2  ;;  %s354_s5 = scalar_lea.vmem (%p4350_p4), [#allocation4], %s3077_s28 }
  0x31   : > { %s359_s16 = scalar_lea.vmem %s4940_s3, %s3080_s18 }
  0x32   : > { %v375_v0 = vld [vmem:[%s359_s16] sm:$0xf]  ;;  %v377_v1 = vld [vmem:[%s359_s16 + $0x8] sm:$0xf]  ;;  %v379_v2 = vld [vmem:[%s359_s16 + $0x10] sm:$0xf] }
  0x33   : > { %376 = vst [vmem:[%s354_s5] sm:$0xf] %v375_v0  ;;  %378 = vst [vmem:[%s354_s5 + $0x4] sm:$0xf] %v377_v1  ;;  %v381_v3 = vld [vmem:[%s359_s16 + $0x18] sm:$0xf] }
  0x34   : > { %380 = vst [vmem:[%s354_s5 + $0x8] sm:$0xf] %v379_v2  ;;  %v383_v4 = vld [vmem:[%s359_s16 + $0x20] sm:$0xf]  ;;  %v385_v5 = vld [vmem:[%s359_s16 + $0x28] sm:$0xf] }
  0x35   : > { %382 = vst [vmem:[%s354_s5 + $0xc] sm:$0xf] %v381_v3  ;;  %384 = vst [vmem:[%s354_s5 + $0x10] sm:$0xf] %v383_v4  ;;  %v387_v6 = vld [vmem:[%s359_s16 + $0x30] sm:$0xf] }
  0x36   : > { %386 = vst [vmem:[%s354_s5 + $0x14] sm:$0xf] %v385_v5  ;;  %v389_v7 = vld [vmem:[%s359_s16 + $0x38] sm:$0xf]  ;;  %388 = vst [vmem:[%s354_s5 + $0x18] sm:$0xf] %v387_v6 }
  0x37   : > { %390 = vst [vmem:[%s354_s5 + $0x1c] sm:$0xf] %v389_v7 }
  0x38 PF: > { %p3081_p12 = scmp.ge.s32.totalorder %s4228_s19, 1  ;;  %p443_p13 = scmp.lt.s32.totalorder %s4228_s19, 17 }
  0x3a   : > { %p444_p0 = pnand %p3081_p12, %p443_p13 }
  0x3b   : > { %s450_s18 = sand.u32 (!%p444_p0), 1, %s4196_s11   ;;  %s504_s23 = sand.u32 (!%p444_p0), 1, %s4188_s30  }
  0x3c   : > { %447 = sbr.rel (%p444_p0) target bundleno = 3663 (0xe4f), region = 89  ;;  %s3082_s25 = sshll.u32 (!%p444_p0), %s450_s18, 5 }
  0x3d   : > { %s3083_s26 = sshll.u32 (!%p444_p0), %s504_s23, 5  ;;  %s3084_s27 = sshll.u32 (!%p444_p0), %s4204_s13, 3 }
  0x3e   : > { %p519_p1 = scmp.lt.s32.totalorder (!%p444_p0), %s4212_s15, 1  ;;  %p521_p2 = scmp.lt.s32.totalorder (!%p444_p0), %s3084_s27, 31 }
  0x3f   : > { %s3087_s22 = sshll.u32 (!%p444_p0), %s4208_s14, 4  ;;  %p534_p4 = scmp.lt.s32.totalorder (!%p444_p0), %s4208_s14, 1 }
  0x40   : > { %p529_p3 = scmp.lt.s32.totalorder (!%p444_p0), %s3087_s22, 31  ;;  %s3089_s16 = sshll.u32 (!%p444_p0), %s4208_s14, 3 }
  0x41   : > { %s4941_s0 = sld [smem:[#allocation17_spill]] (!%p444_p0)  ;;  %p542_p5 = scmp.lt.s32.totalorder (!%p444_p0), %s3089_s16, 15 }
  0x42   : > { %s4430_s29 = scalar_lea.vmem (!%p444_p0), [#allocation5], %s3083_s26  ;;  %p3094_p6 = scmp.ne.s32.totalorder (!%p444_p0), %s4204_s13, 0 }
  0x43   : > { %s520_s24 = scalar_select %p519_p1, %s4212_s15, 1 }
  0x44   : > { %s4970_s27 = smov (!%p521_p2, %s3084_s27), 31  ;;  %s4972_s22 = smov (!%p529_p3, %s3087_s22), 31 }
  0x45   : > { %s3085_s28 = sshll.u32 %s520_s24, 5  ;;  %s3088_s18 = sshll.u32 %s4972_s22, 2  ;;  %v4230_v8 = vmov (!%p3094_p6), 0.0  }
  0x46   : > { %s524_s8 = sadd.s32 %s3085_s28, %s4970_s27  ;;  %s554_s23 = sadd.s32 %s3085_s28, %s4972_s22  ;;  %563 = vst [vmem:[#allocation2] sm:$0xff] (!%p3094_p6), %v4230_v8  ;;  %564 = vst [vmem:[#allocation2 + $0x8] sm:$0xff] (!%p3094_p6), %v4230_v8 }
  0x47   : > { %s3086_s20 = sshll.u32 %s524_s8, 2  ;;  %s4408_s27 = scalar_lea.vmem %s4902_s1, %s3088_s18  ;;  %565 = vst [vmem:[#allocation2 + $0x10] sm:$0xff] (!%p3094_p6), %v4230_v8  ;;  %566 = vst [vmem:[#allocation2 + $0x18] sm:$0xff] (!%p3094_p6), %v4230_v8 }
  0x48   : > { %s4400_s11 = scalar_lea.vmem %s4941_s0, %s3086_s20  ;;  %s3093_s0 = sshll.u32 %s554_s23, 2  ;;  %567 = vst [vmem:[#allocation2 + $0x20] sm:$0xff] (!%p3094_p6), %v4230_v8  ;;  %568 = vst [vmem:[#allocation2 + $0x28] sm:$0xff] (!%p3094_p6), %v4230_v8 }
  0x49   : > { %s4403_s30 = scalar_select %p534_p4, %s4208_s14, 1 }
  0x4a   : > { %s4974_s16 = smov (!%p542_p5, %s3089_s16), 15  ;;  %s4421_s19 = scalar_lea.vmem %s4910_s9, %s3093_s0  ;;  %569 = vst [vmem:[#allocation2 + $0x30] sm:$0xff] (!%p3094_p6), %v4230_v8  ;;  %570 = vst [vmem:[#allocation2 + $0x38] sm:$0xff] (!%p3094_p6), %v4230_v8 }
  0x4b   : > { %s536_s12 = scalar_lea.vmem %s4903_s2, %s4403_s30  ;;  %s540_s5 = scalar_lea.vmem %s4905_s4, %s4403_s30  ;;  %571 = vst [vmem:[#allocation3] sm:$0x1] (!%p3094_p6), %v4230_v8 }
  0x4c   : > { %s3090_s22 = sshll.u32 %s4974_s16, 3  ;;  %s4428_s24 = scalar_lea.vmem [#allocation4], %s3082_s25 }
  0x4d   : > { %s4426_s18 = scalar_lea.vmem %s4908_s7, %s3090_s22  ;;  %562 = sbr.rel (%p3094_p6) target bundleno = 84 (0x54), region = 97 }
  0x54 PF: > { %v3940_v9 = vld [vmem:[%s4408_s27] sm:$0xff]   ;;  %vm663_vm0 = vcmask 523264   ;;  %v3941_v10 = vld [vmem:[%s4408_s27 + $0x8] sm:$0xff]   ;;  %v3942_v12 = vld [vmem:[%s4408_s27 + $0x10] sm:$0xff]   ;;  %s4231_s21 = smov 64   ;;  %s4942_s26 = sld [smem:[#allocation19_spill]] }
  0x55   : > { %3838 = vmatprep.subr.msk.bf16.mxu0 %vm663_vm0, %v3940_v9  ;;  %v677_v11 = vsel %vm663_vm0, %v3940_v9, 0  ;;  %v680_v13 = vsel %vm663_vm0, %v3941_v10, 0  ;;  %v3948_v14 = vld [vmem:[%s4400_s11] sm:$0xff]   ;;  %v683_v15 = vsel %vm663_vm0, %v3942_v12, 0  ;;  %v3943_v16 = vld [vmem:[%s4408_s27 + $0x18] sm:$0xff]   ;;  %v3945_v20 = vld [vmem:[%s4408_s27 + $0x28] sm:$0xff]  }
  0x56   : > { %3447 = vmatpush3.bf16.xpose.msra.mxu0 %v677_v11  ;;  %3462 = vmatprep.mubr.msk.bf16.mxu0 %vm663_vm0, %v3948_v14  ;;  %v686_v17 = vsel %vm663_vm0, %v3943_v16, 0  ;;  %v3944_v18 = vld [vmem:[%s4408_s27 + $0x20] sm:$0xff]   ;;  %v692_v21 = vsel %vm663_vm0, %v3945_v20, 0  ;;  %v3946_v22 = vld [vmem:[%s4408_s27 + $0x30] sm:$0xff]   ;;  %v3947_v24 = vld [vmem:[%s4408_s27 + $0x38] sm:$0xff]   ;;  %p3141_p7 = scmp.ne.s32.totalorder %s4204_s13, 3 }
  0x57   : > { %3839 = vmatprep.subr.msk.bf16.mxu0 %vm663_vm0, %v3941_v10  ;;  %v689_v19 = vsel %vm663_vm0, %v3944_v18, 0  ;;  %v695_v23 = vsel %vm663_vm0, %v3946_v22, 0  ;;  %v698_v25 = vsel %vm663_vm0, %v3947_v24, 0  ;;  %v3949_v26 = vld [vmem:[%s4400_s11 + $0x8] sm:$0xff]   ;;  %v3950_v27 = vld [vmem:[%s4400_s11 + $0x10] sm:$0xff]   ;;  %v3951_v28 = vld [vmem:[%s4400_s11 + $0x18] sm:$0xff]  }
  0x58   : > { %v3952_v29 = vld [vmem:[%s4428_s24] sm:$0xff]   ;;  %v3953_v30 = vld [vmem:[%s4428_s24 + $0x8] sm:$0xff]   ;;  %v3954_v31 = vld [vmem:[%s4428_s24 + $0x10] sm:$0xff]   ;;  %s4943_s16 = sld [smem:[#allocation20_spill]] (!%p3141_p7)  ;;  %vm1324_vm1 = vcmask (!%p3141_p7), 261120   ;;  %s4233_s22 = smov (!%p3141_p7), 64  }
  0x59   : > { %3470 = vmatprep.subr.bf16.mxu1 %v3952_v29  ;;  %v3955_v32 = vld [vmem:[%s4428_s24 + $0x18] sm:$0xff]   ;;  %vm4589_vm2 = vmpackc.low (!%p3141_p7), %vm1324_vm1, %vm1324_vm1  ;;  %vm2025_vm3 = vcmask (!%p3141_p7), 519168  }
  0x5a   : > { %3471 = vmatpush3.bf16.msra.mxu1 %v3952_v29  ;;  %v3095_v34 = vld [vmem:[%s536_s12] ss:$0 sm:$0xff]  ;;  %v3957_v59 = vld [vmem:[%s4942_s26 + $0x8] sm:$0xff]   ;;  %v3959_v14 = vld [vmem:[%s4942_s26 + $0x18] sm:$0xff]  }
  0x5b   : > { %3472 = vmatprep.subr.bf16.mxu1 %v3953_v30  ;;  %v3956_v58 = vld [vmem:[%s4942_s26] sm:$0xff]  }
  0x5c   : > { %v3112_v60 = vld [vmem:[%s540_s5] ss:$0 sm:$0xff]  ;;  %s4232_s5 = smov (!%p3141_p7), 96  }
  0x5e   : > { %3449 = vmatpush3.bf16.xpose.msra.mxu0 %v680_v13  ;;  %3473 = vmatpush3.bf16.msra.mxu1 %v3953_v30  ;;  %s4944_s23 = smov (!%p3141_p7), %s4943_s16 }
  0x5f   : > { %3840 = vmatprep.subr.msk.bf16.mxu0 %vm663_vm0, %v3942_v12  ;;  %3474 = vmatprep.subr.bf16.mxu1 %v3954_v31  ;;  %v3958_v12 = vld [vmem:[%s4942_s26 + $0x10] sm:$0xff]  }
  0x62   : > { %3475 = vmatpush3.bf16.msra.mxu1 %v3954_v31 }
  0x63   : > { %3476 = vmatprep.subr.bf16.mxu1 %v3955_v32 }
  0x66   : > { %3451 = vmatpush3.bf16.xpose.msra.mxu0 %v683_v15  ;;  %3477 = vmatpush3.bf16.msra.mxu1 %v3955_v32  ;;  %v3960_v15 = vld [vmem:[%s4942_s26 + $0x20] sm:$0xff]  }
  0x67   : > { %3841 = vmatprep.subr.msk.bf16.mxu0 %vm663_vm0, %v3943_v16  ;;  %3486 = vmatprep.subr.bf16.mxu1 %v3956_v58  ;;  %v3961_v16 = vld [vmem:[%s4942_s26 + $0x28] sm:$0xff]  }
  0x6e   : > { %3453 = vmatpush3.bf16.xpose.msra.mxu0 %v686_v17  ;;  %v3962_v17 = vld [vmem:[%s4942_s26 + $0x30] sm:$0xff]  }
  0x6f   : > { %3842 = vmatprep.subr.msk.bf16.mxu0 %vm663_vm0, %v3944_v18  ;;  %v3963_v18 = vld [vmem:[%s4942_s26 + $0x38] sm:$0xff]  }
  0x76   : > { %3455 = vmatpush3.bf16.xpose.msra.mxu0 %v689_v19 }
  0x77   : > { %3843 = vmatprep.subr.msk.bf16.mxu0 %vm663_vm0, %v3945_v20 }
  0x7e   : > { %3457 = vmatpush3.bf16.xpose.msra.mxu0 %v692_v21 }
  0x7f   : > { %3844 = vmatprep.subr.msk.bf16.mxu0 %vm663_vm0, %v3946_v22 }
  0x86   : > { %3459 = vmatpush3.bf16.xpose.msra.mxu0 %v695_v23 }
  0x87   : > { %3845 = vmatprep.subr.msk.bf16.mxu0 %vm663_vm0, %v3947_v24 }
  0x8e   : > { %3461 = vmatpush3.bf16.xpose.msra.mxu0 %v698_v25 }
  0x95   : > { %3463 = vmatmul.mubr.msk.bf16.vlgmr.msra.gmra.mrb[0].mxu0 %vm663_vm0, %v3949_v26 }
  0x96   : > { %3466 = vmatprep.mubr.msk.bf16.mxu0 %vm663_vm0, %v3950_v27 }
  0x9d   : > { %3467 = vmatmul.mubr.msk.bf16.gmra.mrb[4].mxu0 %vm663_vm0, %v3951_v28 }
 0x168   : > { %v3464_v33 = vpop.f32.mrb[0].mxu0 }
 0x169   : > { %v734_v35 = vpop.f32.mrb[1].mxu0  ;;  %v743_v37 = vadd.f32 %v3464_v33, %v3095_v34 }
 0x16a   : > { %v3465_v36 = vpop.f32.mrb[2].mxu0  ;;  %v735_v40 = vadd.f32 %v3095_v34, %v734_v35 }
 0x16b   : > { %v746_v38 = vadd.f32 %v3465_v36, %v3095_v34  ;;  %v737_v39 = vpop.f32.mrb[3].mxu0 }
 0x16c   : > { %v738_v41 = vadd.f32 %v3095_v34, %v737_v39 }
 0x16d   : > { %v4474_v42 = vpack.c.bf16 %v746_v38, %v743_v37 }
 0x16e   : > { %v4476_v43 = vpack.c.bf16 %v738_v41, %v735_v40 }
 0x170   : > { %v3468_v44 = vpop.f32.mrb[4].mxu0  ;;  %788 = vrot.lane.b32.xlu0 %v4476_v43, %s4231_s21 }
 0x171   : > { %v759_v45 = vadd.f32 %v3468_v44, %v3095_v34  ;;  %v750_v46 = vpop.f32.mrb[5].mxu0 }
 0x172   : > { %v751_v47 = vadd.f32 %v3095_v34, %v750_v46  ;;  %v3469_v48 = vpop.f32.mrb[6].mxu0 }
 0x173   : > { %v762_v49 = vadd.f32 %v3469_v48, %v3095_v34  ;;  %v753_v50 = vpop.f32.mrb[7].mxu0 }
 0x174   : > { %v754_v51 = vadd.f32 %v3095_v34, %v753_v50  ;;  %790 = vrot.lane.b32.xlu0 %v4474_v42, %s4231_s21 }
 0x175   : > { %v4480_v52 = vpack.c.bf16 %v762_v49, %v759_v45 }
 0x176   : > { %v767_v53 = vpack.c.bf16 %v754_v51, %v751_v47 }
 0x178   : > { %792 = vrot.lane.b32.xlu1 %v767_v53, %s4231_s21 }
 0x17c   : > { %794 = vrot.lane.b32.xlu1 %v4480_v52, %s4231_s21 }
 0x1e2   : > { %v789_v54 = vpop.permute.xlu0 %788 }
 0x1e3   : > { %3478 = vmatprep.mubr.msk.bf16.mxu1 %vm663_vm0, %v789_v54 }
 0x1e6   : > { %v791_v55 = vpop.permute.xlu0 %790 }
 0x1e7   : > { %3479 = vmatmul.mubr.msk.bf16.vlgmr.msra.gmra.mrb[0].mxu1 %vm663_vm0, %v791_v55 }
 0x1e8   : > { %3487 = vmatpush3.bf16.msra.mxu1 %v3956_v58 }
 0x1e9   : > { %3488 = vmatprep.subr.bf16.mxu1 %v3957_v59 }
 0x1ea   : > { %v793_v56 = vpop.permute.xlu1 %792 }
 0x1eb   : > { %3482 = vmatprep.mubr.msk.bf16.mxu1 %vm663_vm0, %v793_v56 }
 0x1ec   : > { %3489 = vmatpush3.bf16.msra.mxu1 %v3957_v59 }
 0x1ed   : > { %3490 = vmatprep.subr.bf16.mxu1 %v3958_v12 }
 0x1ee   : > { %v795_v57 = vpop.permute.xlu1 %794 }
 0x1ef   : > { %3483 = vmatmul.mubr.msk.bf16.gmra.mrb[4].mxu1 %vm663_vm0, %v795_v57 }
 0x1f0   : > { %3491 = vmatpush3.bf16.msra.mxu1 %v3958_v12 }
 0x1f1   : > { %3492 = vmatprep.subr.bf16.mxu1 %v3959_v14 }
 0x1f4   : > { %3493 = vmatpush3.bf16.msra.mxu1 %v3959_v14 }
 0x1f5   : > { %3494 = vmatprep.subr.bf16.mxu1 %v3960_v15 }
 0x1f8   : > { %3495 = vmatpush3.bf16.msra.mxu1 %v3960_v15 }
 0x1f9   : > { %3496 = vmatprep.subr.bf16.mxu1 %v3961_v16 }
 0x1fc   : > { %3497 = vmatpush3.bf16.msra.mxu1 %v3961_v16 }
 0x1fd   : > { %3498 = vmatprep.subr.bf16.mxu1 %v3962_v17 }
 0x200   : > { %3499 = vmatpush3.bf16.msra.mxu1 %v3962_v17 }
 0x201   : > { %3500 = vmatprep.subr.bf16.mxu1 %v3963_v18 }
 0x204   : > { %3501 = vmatpush3.bf16.msra.mxu1 %v3963_v18 }
 0x2ba   : > { %v3480_v61 = vpop.f32.mrb[0].mxu1 }
 0x2bb   : > { %v866_v62 = vpop.f32.mrb[1].mxu1  ;;  %v875_v3 = vadd.f32 %v3480_v61, %v3112_v60 }
 0x2bc   : > { %v867_v63 = vadd.f32 %v3112_v60, %v866_v62  ;;  %v3481_v0 = vpop.f32.mrb[2].mxu1 }
 0x2bd   : > { %v869_v1 = vpop.f32.mrb[3].mxu1  ;;  %v878_v6 = vadd.f32 %v3481_v0, %v3112_v60 }
 0x2be   : > { %v870_v2 = vadd.f32 %v3112_v60, %v869_v1  ;;  %897 = vmax.xlane.f32.xlu0 %v867_v63 }
 0x2c0   : > { %899 = vmax.xlane.f32.xlu1 %v870_v2 }
 0x2c2   : > { %v3484_v4 = vpop.f32.mrb[4].mxu1  ;;  %901 = vmax.xlane.f32.xlu0 %v875_v3 }
 0x2c3   : > { %v882_v5 = vpop.f32.mrb[5].mxu1  ;;  %v891_v10 = vadd.f32 %v3484_v4, %v3112_v60 }
 0x2c4   : > { %v883_v7 = vadd.f32 %v3112_v60, %v882_v5  ;;  %v3485_v8 = vpop.f32.mrb[6].mxu1 }
 0x2c5   : > { %v885_v9 = vpop.f32.mrb[7].mxu1  ;;  %v894_v13 = vadd.f32 %v3485_v8, %v3112_v60 }
 0x2c6   : > { %905 = vmax.xlane.f32.xlu1 %v883_v7  ;;  %903 = vmax.xlane.f32.xlu0 %v878_v6  ;;  %v886_v11 = vadd.f32 %v3112_v60, %v885_v9 }
 0x2ca   : > { %909 = vmax.xlane.f32.xlu1 %v891_v10  ;;  %907 = vmax.xlane.f32.xlu0 %v886_v11 }
 0x2ce   : > { %911 = vmax.xlane.f32.xlu0 %v894_v13 }
 0x2f7   : > { %1134 = vxpose.xlu1.c.b16.start [1/4] (short) (narrow) %v4476_v43, 64 }
 0x2fb   : > { %1135 = vxpose.xlu1.c.b16.cont [2/4] (short) (narrow) %v4474_v42, 64 }
 0x2ff   : > { %1136 = vxpose.xlu1.c.b16.cont [3/4] (short) (narrow) %v767_v53, 64 }
 0x303   : > { %1137 = vxpose.xlu1.c.b16.end [4/4] (short) (narrow) %v4480_v52, 64 }
 0x34b   : > { %v898_v19 = vpop.xlane.xlu0 %897 }
 0x34c   : > { %v913_v20 = vsub.f32 %v867_v63, %v898_v19 }
 0x34d   : > { %v900_v21 = vpop.xlane.xlu1 %899 }
 0x34e   : > { %v921_v22 = vmul.f32 1.442695, %v913_v20  ;;  %v914_v23 = vsub.f32 %v870_v2, %v900_v21 }
 0x34f   : > { %v902_v24 = vpop.xlane.xlu0 %901 }
 0x350   : > { %v923_v25 = vmul.f32 1.442695, %v914_v23  ;;  %v915_v26 = vsub.f32 %v875_v3, %v902_v24  ;;  %3964 = vpow2.f32 %v921_v22 }
 0x352   : > { %3966 = vpow2.f32 %v923_v25  ;;  %v925_v29 = vmul.f32 1.442695, %v915_v26 }
 0x353   : > { %v906_v27 = vpop.xlane.xlu1 %905  ;;  %v904_v28 = vpop.xlane.xlu0 %903 }
 0x354   : > { %v917_v30 = vsub.f32 %v883_v7, %v906_v27  ;;  %v916_v31 = vsub.f32 %v878_v6, %v904_v28  ;;  %3968 = vpow2.f32 %v925_v29 }
 0x356   : > { %v927_v32 = vmul.f32 1.442695, %v916_v31  ;;  %v929_v35 = vmul.f32 1.442695, %v917_v30 }
 0x357   : > { %v910_v33 = vpop.xlane.xlu1 %909  ;;  %v908_v34 = vpop.xlane.xlu0 %907 }
 0x358   : > { %v919_v36 = vsub.f32 %v891_v10, %v910_v33  ;;  %v918_v37 = vsub.f32 %v886_v11, %v908_v34  ;;  %3970 = vpow2.f32 %v927_v32  ;;  %v1243_v34 = vld [vmem:[#allocation3] sm:$0x1] }
 0x359   : > { %3972 = vpow2.f32 %v929_v35 }
 0x35a   : > { %v931_v38 = vmul.f32 1.442695, %v918_v37  ;;  %v3965_v39 = vpop.eup %3964  ;;  %v933_v40 = vmul.f32 1.442695, %v919_v36 }
 0x35b   : > { %v912_v41 = vpop.xlane.xlu0 %911 }
 0x35c   : > { %v3967_v42 = vpop.eup %3966  ;;  %v920_v43 = vsub.f32 %v894_v13, %v912_v41  ;;  %3974 = vpow2.f32 %v931_v38  ;;  %v1128_v38 = vld [vmem:[#allocation2 + $0x10] sm:$0xff]  ;;  %v1129_v41 = vld [vmem:[#allocation2 + $0x18] sm:$0xff] }
 0x35d   : > { %v937_v44 = vpack.c.bf16 %v3967_v42, %v3965_v39  ;;  %3976 = vpow2.f32 %v933_v40  ;;  %v1142_v55 = vpop.trf.xlu1 }
 0x35e   : > { %v935_v45 = vmul.f32 1.442695, %v920_v43  ;;  %v3969_v46 = vpop.eup %3968 }
 0x35f   : > { %3502 = vmatprep.mubr.bf16.mxu1 %v937_v44  ;;  %v1127_v44 = vld [vmem:[#allocation2 + $0x8] sm:$0xff] }
 0x360   : > { %3978 = vpow2.f32 %v935_v45 }
 0x361   : > { %v1143_v26 = vpop.trf.xlu1 }
 0x362   : > { %v3971_v47 = vpop.eup %3970 }
 0x363   : > { %v938_v48 = vpack.c.bf16 %v3971_v47, %v3969_v46  ;;  %v3973_v49 = vpop.eup %3972 }
 0x365   : > { %3503 = vmatmul.mubr.bf16.vlgmr.msra.gmra.mrb[8].mxu1 %v938_v48  ;;  %v1144_v30 = vpop.trf.xlu1 }
 0x366   : > { %v3975_v50 = vpop.eup %3974 }
 0x367   : > { %v939_v51 = vpack.c.bf16 %v3975_v50, %v3973_v49  ;;  %v3977_v52 = vpop.eup %3976 }
 0x369   : > { %3506 = vmatprep.mubr.bf16.mxu1 %v939_v51  ;;  %v1145_v35 = vpop.trf.xlu1  ;;  %v1130_v51 = vld [vmem:[#allocation2 + $0x20] sm:$0xff] }
 0x36a   : > { %v3979_v53 = vpop.eup %3978 }
 0x36b   : > { %v940_v54 = vpack.c.bf16 %v3979_v53, %v3977_v52 }
 0x36d   : > { %3507 = vmatmul.mubr.bf16.gmra.mrb[12].mxu1 %v940_v54 }
 0x36e   : > { %3518 = vmatprep.mubr.msk.bf16.mxu1 %vm663_vm0, %v1142_v55 }
 0x438   : > { %v3504_v56 = vpop.f32.mrb[8].mxu1 }
 0x439   : > { %3980 = vrcp.f32 %v3504_v56  ;;  %v1039_v57 = vpop.f32.mrb[9].mxu1  ;;  %v1131_v56 = vld [vmem:[#allocation2 + $0x28] sm:$0xff] }
 0x43a   : > { %3982 = vrcp.f32 %v1039_v57  ;;  %v3505_v58 = vpop.f32.mrb[10].mxu1 }
 0x43b   : > { %3984 = vrcp.f32 %v3505_v58  ;;  %v1042_v59 = vpop.f32.mrb[11].mxu1 }
 0x43c   : > { %3986 = vrcp.f32 %v1042_v59 }
 0x440   : > { %v3508_v60 = vpop.f32.mrb[12].mxu1 }
 0x441   : > { %3988 = vrcp.f32 %v3508_v60  ;;  %v1055_v61 = vpop.f32.mrb[13].mxu1 }
 0x442   : > { %3990 = vrcp.f32 %v1055_v61  ;;  %v3509_v62 = vpop.f32.mrb[14].mxu1 }
 0x443   : > { %v3981_v63 = vpop.eup %3980  ;;  %3992 = vrcp.f32 %v3509_v62  ;;  %v1058_v0 = vpop.f32.mrb[15].mxu1 }
 0x444   : > { %v3983_v1 = vpop.eup %3982  ;;  %3994 = vrcp.f32 %v1058_v0  ;;  %v1080_v4 = vmul.f32 %v3981_v63, %v3969_v46  ;;  %v1288_v0 = vld [vmem:[%s4943_s16] sm:$0xff] (!%p3141_p7) }
 0x445   : > { %v3985_v2 = vpop.eup %3984  ;;  %v1078_v6 = vmul.f32 %v3983_v1, %v3965_v39  ;;  %v1126_v39 = vld [vmem:[#allocation2] sm:$0xff]  ;;  %v1279_v1 = vlaneseq (!%p3141_p7) }
 0x446   : > { %v3987_v3 = vpop.eup %3986  ;;  %v1081_v5 = vmul.f32 %v3985_v2, %v3971_v47  ;;  %v1289_v2 = vld [vmem:[%s4944_s23 + $0x8] sm:$0xff] (!%p3141_p7) }
 0x447   : > { %v1079_v7 = vmul.f32 %v3987_v3, %v3967_v42  ;;  %v4534_v3 = vpack.c.bf16 (!%p3141_p7), %v1289_v2, %v1288_v0 }
 0x448   : > { %v1087_v8 = vpack.c.bf16 %v1081_v5, %v1080_v4 }
 0x449   : > { %v1086_v9 = vpack.c.bf16 %v1079_v7, %v1078_v6  ;;  %v1244_v10 = vadd.f32 %v1079_v7, %v1078_v6  ;;  %3719 = vmatprep.subr.bf16.mxu0 (!%p3141_p7), %v4534_v3 }
 0x44a   : > { %3291 = vst [vmem:[%s4430_s29 + $0x8] sm:$0xff] %v1087_v8   ;;  %3721 = vmatpush3.bf16.msra.mxu0 (!%p3141_p7), %v4534_v3 }
 0x44b   : > { %v3989_v11 = vpop.eup %3988  ;;  %3275 = vst [vmem:[%s4430_s29] sm:$0xff] %v1086_v9   ;;  %3510 = vmatprep.subr.bf16.mxu1 %v1086_v9  ;;  %v1245_v12 = vadd.f32 %v1244_v10, %v1080_v4  ;;  %v1280_v4 = vshrl.u32 (!%p3141_p7), %v1279_v1, 7 }
 0x44c   : > { %v3991_v13 = vpop.eup %3990  ;;  %3511 = vmatpush3.bf16.msra.mxu1 %v1086_v9  ;;  %v1084_v18 = vmul.f32 %v3989_v11, %v3977_v52  ;;  %v1290_v11 = vld [vmem:[%s4944_s23 + $0x10] sm:$0xff] (!%p3141_p7) }
 0x44d   : > { %v3993_v14 = vpop.eup %3992  ;;  %3512 = vmatprep.subr.bf16.mxu1 %v1087_v8  ;;  %v1246_v15 = vadd.f32 %v1245_v12, %v1081_v5  ;;  %v1082_v16 = vmul.f32 %v3991_v13, %v3973_v49  ;;  %v1281_v5 = vsub.s32 (!%p3141_p7), 0, %v1280_v4  ;;  %v1291_v12 = vld [vmem:[%s4944_s23 + $0x18] sm:$0xff] (!%p3141_p7) }
 0x44e   : > { %v3995_v17 = vpop.eup %3994  ;;  %v1085_v19 = vmul.f32 %v3993_v14, %v3979_v53  ;;  %v1133_v53 = vld [vmem:[#allocation2 + $0x38] sm:$0xff]  ;;  %v4547_v13 = vpack.c.bf16 (!%p3141_p7), %v1291_v12, %v1290_v11 }
 0x44f   : > { %v1083_v20 = vmul.f32 %v3995_v17, %v3975_v50  ;;  %v1247_v21 = vadd.f32 %v1246_v15, %v1082_v16  ;;  %v1132_v50 = vld [vmem:[#allocation2 + $0x30] sm:$0xff] }
 0x450   : > { %3513 = vmatpush3.bf16.msra.mxu1 %v1087_v8  ;;  %v1089_v22 = vpack.c.bf16 %v1085_v19, %v1084_v18  ;;  %3723 = vmatprep.subr.bf16.mxu0 (!%p3141_p7), %v4547_v13 }
 0x451   : > { %v1088_v23 = vpack.c.bf16 %v1083_v20, %v1082_v16  ;;  %v1248_v24 = vadd.f32 %v1247_v21, %v1083_v20  ;;  %3725 = vmatpush3.bf16.msra.mxu0 (!%p3141_p7), %v4547_v13 }
 0x452   : > { %3293 = vst [vmem:[%s4430_s29 + $0x18] sm:$0xff] %v1089_v22  }
 0x453   : > { %3292 = vst [vmem:[%s4430_s29 + $0x10] sm:$0xff] %v1088_v23   ;;  %3514 = vmatprep.subr.bf16.mxu1 %v1088_v23  ;;  %v1249_v25 = vadd.f32 %v1248_v24, %v1084_v18 }
 0x454   : > { %3515 = vmatpush3.bf16.msra.mxu1 %v1088_v23 }
 0x455   : > { %3516 = vmatprep.subr.bf16.mxu1 %v1089_v22  ;;  %v1250_v27 = vadd.f32 %v1249_v25, %v1085_v19 }
 0x457   : > { %v1251_v28 = vrot.slane %v1250_v27, 4 }
 0x458   : > { %3517 = vmatpush3.bf16.msra.mxu1 %v1089_v22 }
 0x459   : > { %v1252_v29 = vadd.f32 %v1251_v28, %v1250_v27 }
 0x45b   : > { %v1253_v31 = vrot.slane %v1252_v29, 2  ;;  %3519 = vmatmul.mubr.msk.bf16.vlgmr.msra.gmra.mrb[16].mxu1 %vm663_vm0, %v1143_v26 }
 0x45c   : > { %3522 = vmatprep.mubr.msk.bf16.mxu1 %vm663_vm0, %v1144_v30 }
 0x45d   : > { %v1254_v32 = vadd.f32 %v1253_v31, %v1252_v29 }
 0x45f   : > { %v1255_v33 = vrot.slane %v1254_v32, 1 }
 0x461   : > { %v1256_v36 = vadd.f32 %v1255_v33, %v1254_v32 }
 0x463   : > { %v1257_v37 = vadd.f32 %v1256_v36, %v1243_v34  ;;  %3523 = vmatmul.mubr.msk.bf16.gmra.mrb[20].mxu1 %vm663_vm0, %v1145_v35 }
 0x465   : > { %1258 = vst [vmem:[#allocation3] sm:$0x1] %v1257_v37 }
 0x46c   : > { %v1263_v62 = vld [vmem:[#allocation3] sm:$0x1] (!%p3141_p7) }
 0x46d   : > { %v1264_v63 = vadd.f32 (!%p3141_p7), 1e-05, %v1263_v62 }
 0x46f   : > { %4076 = vrcp.f32 (!%p3141_p7), %v1264_v63 }
 0x479   : > { %v4077_v6 = vpop.eup (!%p3141_p7), %4076 }
 0x47a   : > { %v4538_v8 = vrot.slane (!%p3141_p7), %v4077_v6, %v1281_v5 }
 0x52e   : > { %v3520_v40 = vpop.f32.mrb[16].mxu1 }
 0x52f   : > { %v1229_v42 = vadd.f32 %v3520_v40, %v1128_v38  ;;  %v1196_v43 = vpop.f32.mrb[17].mxu1 }
 0x530   : > { %v1227_v45 = vadd.f32 %v1196_v43, %v1126_v39  ;;  %v3521_v46 = vpop.f32.mrb[18].mxu1 }
 0x531   : > { %1237 = vst [vmem:[#allocation2 + $0x10] sm:$0xff] %v1229_v42  ;;  %v1230_v47 = vadd.f32 %v3521_v46, %v1129_v41  ;;  %v1199_v48 = vpop.f32.mrb[19].mxu1 }
 0x532   : > { %1235 = vst [vmem:[#allocation2] sm:$0xff] %v1227_v45  ;;  %v1228_v49 = vadd.f32 %v1199_v48, %v1127_v44 }
 0x533   : > { %1238 = vst [vmem:[#allocation2 + $0x18] sm:$0xff] %v1230_v47 }
 0x534   : > { %1236 = vst [vmem:[#allocation2 + $0x8] sm:$0xff] %v1228_v49 }
 0x536   : > { %v3524_v52 = vpop.f32.mrb[20].mxu1  ;;  %1262 = sbr.rel (%p3141_p7) target bundleno = 3649 (0xe41), region = 101 }
 0x537   : > { %v1233_v54 = vadd.f32 %v3524_v52, %v1132_v50  ;;  %v1212_v55 = vpop.f32.mrb[21].mxu1 }
 0x538   : > { %v1231_v57 = vadd.f32 %v1212_v55, %v1130_v51  ;;  %v3525_v58 = vpop.f32.mrb[22].mxu1  ;;  %v1276_v15 = vld [vmem:[#allocation2 + $0x10] sm:$0xff] (!%p3141_p7) }
 0x539   : > { %1241 = vst [vmem:[#allocation2 + $0x30] sm:$0xff] %v1233_v54  ;;  %v1234_v59 = vadd.f32 %v3525_v58, %v1133_v53  ;;  %v1215_v60 = vpop.f32.mrb[23].mxu1  ;;  %v1274_v7 = vld [vmem:[#allocation2] sm:$0xff] (!%p3141_p7)  ;;  %v1286_v16 = vmul.f32 (!%p3141_p7), %v4538_v8, %v1276_v15 }
 0x53a   : > { %1239 = vst [vmem:[#allocation2 + $0x20] sm:$0xff] %v1231_v57  ;;  %v1232_v61 = vadd.f32 %v1215_v60, %v1131_v56  ;;  %v1284_v10 = vmul.f32 (!%p3141_p7), %v4538_v8, %v1274_v7  ;;  %v1277_v17 = vld [vmem:[#allocation2 + $0x18] sm:$0xff] (!%p3141_p7) }
 0x53b   : > { %1242 = vst [vmem:[#allocation2 + $0x38] sm:$0xff] %v1234_v59  ;;  %v1275_v9 = vld [vmem:[#allocation2 + $0x8] sm:$0xff] (!%p3141_p7)  ;;  %v1287_v18 = vmul.f32 (!%p3141_p7), %v4538_v8, %v1277_v17 }
 0x53c   : > { %1240 = vst [vmem:[#allocation2 + $0x28] sm:$0xff] %v1232_v61  ;;  %1292 = vxpose.xlu0.b32.start [1/4] (short) (narrow) (!%p3141_p7), %v1284_v10, 64  ;;  %v1285_v14 = vmul.f32 (!%p3141_p7), %v4538_v8, %v1275_v9 }
 0x540   : > { %1293 = vxpose.xlu0.b32.cont [2/4] (short) (narrow) %v1285_v14, 64  ;;  %v2036_v43 = vld [vmem:[#allocation2 + $0x30] sm:$0xff] }
 0x541   : > { %v2034_v39 = vld [vmem:[#allocation2 + $0x20] sm:$0xff]  ;;  %v2040_v44 = vmul.f32 %v2036_v43, %v4538_v8 }
 0x542   : > { %v2038_v41 = vmul.f32 %v2034_v39, %v4538_v8  ;;  %v2037_v45 = vld [vmem:[#allocation2 + $0x38] sm:$0xff] }
 0x543   : > { %v2035_v40 = vld [vmem:[#allocation2 + $0x28] sm:$0xff]  ;;  %v2041_v46 = vmul.f32 %v2037_v45, %v4538_v8 }
 0x544   : > { %1294 = vxpose.xlu0.b32.cont [3/4] (short) (narrow) %v1286_v16, 64  ;;  %v2039_v42 = vmul.f32 %v2035_v40, %v4538_v8 }
 0x548   : > { %1295 = vxpose.xlu0.b32.end [4/4] (short) (narrow) %v1287_v18, 64 }
 0x5bc   : > { %v1308_v19 = vpop.trf.xlu0 }
 0x5bd   : > { %3534 = vmatprep.mubr.msk.f32.mxu0 %vm1324_vm1, %v1308_v19 }
 0x5c0   : > { %v1309_v20 = vpop.trf.xlu0 }
 0x5c1   : > { %3535 = vmatmul.mubr.msk.f32.vlgmr.msra.gmra.mrb[0].mxu0 %vm1324_vm1, %v1309_v20 }
 0x5c4   : > { %v1310_v21 = vpop.trf.xlu0 }
 0x5c5   : > { %3537 = vmatprep.mubr.msk.f32.mxu0 %vm1324_vm1, %v1310_v21 }
 0x5c8   : > { %v1311_v22 = vpop.trf.xlu0 }
 0x5c9   : > { %3538 = vmatmul.mubr.msk.f32.gmra.mrb[2].mxu0 %vm1324_vm1, %v1311_v22 }
 0x5cc   : > { %v1312_v23 = vpop.trf.xlu0 }
 0x5cd   : > { %3540 = vmatprep.mubr.msk.f32.mxu0 %vm1324_vm1, %v1312_v23 }
 0x5d0   : > { %v1313_v24 = vpop.trf.xlu0 }
 0x5d1   : > { %3541 = vmatmul.mubr.msk.f32.gmra.mrb[4].mxu0 %vm1324_vm1, %v1313_v24 }
 0x5d4   : > { %v1314_v25 = vpop.trf.xlu0 }
 0x5d5   : > { %3543 = vmatprep.mubr.msk.f32.mxu0 %vm1324_vm1, %v1314_v25 }
 0x5d8   : > { %v1315_v26 = vpop.trf.xlu0 }
 0x5d9   : > { %3544 = vmatmul.mubr.msk.f32.gmra.mrb[6].mxu0 %vm1324_vm1, %v1315_v26 }
 0x694   : > { %v3536_v27 = vpop.f32.mrb[0].mxu0 }
 0x695   : > { %v1415_v28 = vpop.f32.mrb[1].mxu0 }
 0x696   : > { %v4562_v29 = vpack.i.bf16 %v3536_v27, %v1415_v28  ;;  %3562 = vmatprep.mubr.msk.f32.mxu1 %vm1324_vm1, %v1415_v28 }
 0x698   : > { %3997 = vrot.lane.b32.xlu1 %v4562_v29, %s4232_s5 }
 0x69c   : > { %v3539_v30 = vpop.f32.mrb[2].mxu0 }
 0x69d   : > { %v1425_v31 = vpop.f32.mrb[3].mxu0 }
 0x69e   : > { %v4567_v32 = vpack.i.bf16 %v3539_v30, %v1425_v31 }
 0x6a0   : > { %4002 = vrot.lane.b32.xlu1 %v4567_v32, %s4232_s5 }
 0x6a4   : > { %v3542_v33 = vpop.f32.mrb[4].mxu0 }
 0x6a5   : > { %v1435_v34 = vpop.f32.mrb[5].mxu0 }
 0x6a6   : > { %v4571_v35 = vpack.i.bf16 %v3542_v33, %v1435_v34 }
 0x6a8   : > { %4007 = vrot.lane.b32.xlu1 %v4571_v35, %s4232_s5 }
 0x6ac   : > { %v3545_v36 = vpop.f32.mrb[6].mxu0 }
 0x6ad   : > { %v1445_v37 = vpop.f32.mrb[7].mxu0 }
 0x6ae   : > { %v4575_v38 = vpack.i.bf16 %v3545_v36, %v1445_v37 }
 0x6b0   : > { %4012 = vrot.lane.b32.xlu1 %v4575_v38, %s4232_s5 }
 0x6b4   : > { %2050 = vrot.lane.b32.xlu1 %v2038_v41, %s4233_s22 }
 0x6b8   : > { %2052 = vrot.lane.b32.xlu1 %v2039_v42, %s4233_s22 }
 0x6bc   : > { %2054 = vrot.lane.b32.xlu1 %v2040_v44, %s4233_s22 }
 0x6c0   : > { %2056 = vrot.lane.b32.xlu1 %v2041_v46, %s4233_s22 }
 0x70a   : > { %v3998_v47 = vpop.permute.xlu1 %3997 }
 0x70b   : > { %v4000_v48 = vunpack.i.h.bf16 %v3998_v47  ;;  %v3999_v49 = vunpack.i.l.bf16 %v3998_v47 }
 0x70d   : > { %v3726_v51 = vpack.c.bf16 %v4000_v48, %v3999_v49 }
 0x70f   : > { %3728 = vmatprep.subr.msk.bf16.mxu1 %vm4589_vm2, %v3726_v51 }
 0x710   : > { %3731 = vmatpush3.bf16.xpose.msk.msra.mxu1 %vm4589_vm2, %v3726_v51 }
 0x712   : > { %v4003_v52 = vpop.permute.xlu1 %4002 }
 0x713   : > { %v4005_v53 = vunpack.i.h.bf16 %v4003_v52  ;;  %v4004_v54 = vunpack.i.l.bf16 %v4003_v52 }
 0x715   : > { %v3732_v55 = vpack.c.bf16 %v4005_v53, %v4004_v54 }
 0x717   : > { %3734 = vmatprep.subr.msk.bf16.mxu1 %vm4589_vm2, %v3732_v55 }
 0x718   : > { %3737 = vmatpush3.bf16.xpose.msk.msra.mxu1 %vm4589_vm2, %v3732_v55 }
 0x71a   : > { %v4008_v56 = vpop.permute.xlu1 %4007 }
 0x71b   : > { %v4010_v57 = vunpack.i.h.bf16 %v4008_v56  ;;  %v4009_v58 = vunpack.i.l.bf16 %v4008_v56 }
 0x71d   : > { %v3738_v59 = vpack.c.bf16 %v4010_v57, %v4009_v58 }
 0x71f   : > { %3740 = vmatprep.subr.msk.bf16.mxu1 %vm4589_vm2, %v3738_v59 }
 0x720   : > { %3743 = vmatpush3.bf16.xpose.msk.msra.mxu1 %vm4589_vm2, %v3738_v59 }
 0x722   : > { %v4013_v60 = vpop.permute.xlu1 %4012 }
 0x723   : > { %v4015_v61 = vunpack.i.h.bf16 %v4013_v60  ;;  %v4014_v62 = vunpack.i.l.bf16 %v4013_v60 }
 0x725   : > { %v3744_v63 = vpack.c.bf16 %v4015_v61, %v4014_v62 }
 0x726   : > { %v2051_v24 = vpop.permute.xlu1 %2050 }
 0x727   : > { %3746 = vmatprep.subr.msk.bf16.mxu1 %vm4589_vm2, %v3744_v63 }
 0x728   : > { %3749 = vmatpush3.bf16.xpose.msk.msra.mxu1 %vm4589_vm2, %v3744_v63 }
 0x729   : > { %3775 = vmatprep.subr.bf16.mxu1 %v4534_v3 }
 0x72a   : > { %v2053_v25 = vpop.permute.xlu1 %2052 }
 0x72e   : > { %v2055_v26 = vpop.permute.xlu1 %2054 }
 0x72f   : > { %3563 = vmatmul.mubr.msk.f32.vlgmr.msra.gmra.mrb[0].mxu1 %vm1324_vm1, %v3536_v27 }
 0x730   : > { %3565 = vmatprep.mubr.msk.f32.mxu1 %vm1324_vm1, %v1425_v31  ;;  %3777 = vmatpush3.bf16.msra.mxu1 %v4534_v3 }
 0x731   : > { %3779 = vmatprep.subr.bf16.mxu1 %v4547_v13 }
 0x732   : > { %v2057_v27 = vpop.permute.xlu1 %2056 }
 0x733   : > { %3566 = vmatmul.mubr.msk.f32.gmra.mrb[2].mxu1 %vm1324_vm1, %v3539_v30 }
 0x734   : > { %3568 = vmatprep.mubr.msk.f32.mxu1 %vm1324_vm1, %v1435_v34  ;;  %3781 = vmatpush3.bf16.msra.mxu1 %v4547_v13 }
 0x737   : > { %3569 = vmatmul.mubr.msk.f32.gmra.mrb[4].mxu1 %vm1324_vm1, %v3542_v33 }
 0x738   : > { %3571 = vmatprep.mubr.msk.f32.mxu1 %vm1324_vm1, %v1445_v37 }
 0x73b   : > { %3572 = vmatmul.mubr.msk.f32.gmra.mrb[6].mxu1 %vm1324_vm1, %v3545_v36 }
 0x802   : > { %v3564_v0 = vpop.f32.mrb[0].mxu1 }
 0x803   : > { %v1616_v1 = vmul.f32 0.17677669, %v3564_v0  ;;  %v1576_v2 = vpop.f32.mrb[1].mxu1 }
 0x804   : > { %v1615_v4 = vmul.f32 0.17677669, %v1576_v2 }
 0x805   : > { %v1626_v3 = vsel %vm663_vm0, %v1616_v1, -inf }
 0x806   : > { %1627 = vmax.xlane.f32.xlu1 %v1626_v3  ;;  %v3567_v5 = vpop.f32.mrb[2].mxu1  ;;  %v1623_v6 = vsel %vm663_vm0, %v1615_v4, -inf }
 0x807   : > { %v1618_v7 = vmul.f32 0.17677669, %v3567_v5  ;;  %1624 = vmax.xlane.f32.xlu0 %v1623_v6  ;;  %v1586_v8 = vpop.f32.mrb[3].mxu1 }
 0x808   : > { %v4623_v10 = vmul.f32 0.17677669, %v1586_v8 }
 0x809   : > { %v1632_v9 = vsel %vm663_vm0, %v1618_v7, -inf }
 0x80a   : > { %v3570_v11 = vpop.f32.mrb[4].mxu1  ;;  %v1629_v16 = vsel %vm663_vm0, %v4623_v10, -inf }
 0x80b   : > { %1633 = vmax.xlane.f32.xlu0 %v1632_v9  ;;  %v1596_v12 = vpop.f32.mrb[5].mxu1  ;;  %v1620_v14 = vmul.f32 0.17677669, %v3570_v11 }
 0x80c   : > { %v4625_v13 = vmul.f32 0.17677669, %v1596_v12 }
 0x80d   : > { %v1638_v20 = vsel %vm663_vm0, %v1620_v14, -inf }
 0x80e   : > { %v3573_v15 = vpop.f32.mrb[6].mxu1  ;;  %v1635_v17 = vsel %vm663_vm0, %v4625_v13, -inf }
 0x80f   : > { %1630 = vmax.xlane.f32.xlu0 %v1629_v16  ;;  %1636 = vmax.xlane.f32.xlu1 %v1635_v17  ;;  %v1606_v18 = vpop.f32.mrb[7].mxu1  ;;  %v4631_v19 = vmul.f32 0.17677669, %v3573_v15 }
 0x810   : > { %v4634_v21 = vmul.f32 0.17677669, %v1606_v18 }
 0x811   : > { %v1644_v22 = vsel %vm663_vm0, %v4631_v19, -inf }
 0x812   : > { %v1641_v23 = vsel %vm663_vm0, %v4634_v21, -inf }
 0x813   : > { %1639 = vmax.xlane.f32.xlu0 %v1638_v20 }
 0x817   : > { %1645 = vmax.xlane.f32.xlu0 %v1644_v22 }
 0x81b   : > { %1642 = vmax.xlane.f32.xlu0 %v1641_v23 }
 0x820   : > { %4017 = vrot.lane.b32.xlu1 %v4562_v29, %s4233_s22 }
 0x824   : > { %4022 = vrot.lane.b32.xlu1 %v4567_v32, %s4233_s22 }
 0x828   : > { %4027 = vrot.lane.b32.xlu1 %v4571_v35, %s4233_s22 }
 0x848   : > { %2062 = vxpose.xlu0.b32.start [1/4] (short) (narrow) %v2051_v24, 64 }
 0x84c   : > { %2063 = vxpose.xlu0.b32.cont [2/4] (short) (narrow) %v2053_v25, 64 }
 0x850   : > { %2064 = vxpose.xlu0.b32.cont [3/4] (short) (narrow) %v2055_v26, 64 }
 0x854   : > { %2065 = vxpose.xlu0.b32.end [4/4] (short) (narrow) %v2057_v27, 64 }
 0x893   : > { %v1628_v28 = vpop.xlane.xlu1 %1627 }
 0x894   : > { %v1648_v30 = vsub.f32 %v1616_v1, %v1628_v28  ;;  %v1625_v31 = vpop.xlane.xlu0 %1624 }
 0x895   : > { %v1647_v33 = vsub.f32 %v1615_v4, %v1625_v31 }
 0x896   : > { %v1657_v34 = vmul.f32 1.442695, %v1648_v30 }
 0x897   : > { %v1655_v29 = vmul.f32 1.442695, %v1647_v33  ;;  %v1266_v33 = vld [vmem:[%s4426_s18] sm:$0xff] }
 0x898   : > { %4078 = vpow2.f32 %v1657_v34  ;;  %v1634_v36 = vpop.xlane.xlu0 %1633  ;;  %v1267_v34 = vld [vmem:[%s4426_s18 + $0x8] sm:$0xff] }
 0x899   : > { %v1650_v32 = vsub.f32 %v1618_v7, %v1634_v36  ;;  %4080 = vpow2.f32 %v1655_v29  ;;  %v3766_v29 = vpack.c.bf16 %v1267_v34, %v1266_v33 }
 0x89b   : > { %v1661_v37 = vmul.f32 1.442695, %v1650_v32  ;;  %v1268_v32 = vld [vmem:[%s4426_s18 + $0x10] sm:$0xff] }
 0x89c   : > { %v1631_v35 = vpop.xlane.xlu0 %1630  ;;  %v1637_v39 = vpop.xlane.xlu1 %1636 }
 0x89d   : > { %4082 = vpow2.f32 %v1661_v37  ;;  %v1649_v11 = vsub.f32 %v4623_v10, %v1631_v35  ;;  %v1651_v15 = vsub.f32 %v4625_v13, %v1637_v39  ;;  %v1269_v37 = vld [vmem:[%s4426_s18 + $0x18] sm:$0xff] }
 0x89f   : > { %v1663_v17 = vmul.f32 1.442695, %v1651_v15 }
 0x8a0   : > { %v1640_v40 = vpop.xlane.xlu0 %1639  ;;  %v4018_v41 = vpop.permute.xlu1 %4017 }
 0x8a1   : > { %v1652_v42 = vsub.f32 %v1620_v14, %v1640_v40  ;;  %v4020_v43 = vunpack.i.h.bf16 %v4018_v41  ;;  %v4019_v44 = vunpack.i.l.bf16 %v4018_v41  ;;  %v1659_v14 = vmul.f32 1.442695, %v1649_v11 }
 0x8a2   : > { %v4646_v45 = vpop.eup %4078  ;;  %v3770_v41 = vpack.c.bf16 %v1269_v37, %v1268_v32 }
 0x8a3   : > { %v1665_v46 = vmul.f32 1.442695, %v1652_v42  ;;  %v3750_v47 = vpack.c.bf16 %v4020_v43, %v4019_v44  ;;  %v1674_v48 = vsel %vm663_vm0, %v4646_v45, 0.0  ;;  %v4650_v49 = vpop.eup %4080 }
 0x8a4   : > { %1675 = vadd.xlane.f32.xlu1 %v1674_v48  ;;  %v4023_v51 = vpop.permute.xlu1 %4022  ;;  %v1646_v52 = vpop.xlane.xlu0 %1645  ;;  %v1671_v58 = vsel %vm663_vm0, %v4650_v49, 0.0 }
 0x8a5   : > { %4084 = vpow2.f32 %v1665_v46  ;;  %v4025_v53 = vunpack.i.h.bf16 %v4023_v51  ;;  %v4024_v54 = vunpack.i.l.bf16 %v4023_v51  ;;  %3751 = vmatprep.subr.bf16.mxu0 %v3750_v47  ;;  %v1654_v57 = vsub.f32 %v4631_v19, %v1646_v52 }
 0x8a6   : > { %3753 = vmatpush3.bf16.msra.mxu0 %v3750_v47 }
 0x8a7   : > { %v4652_v55 = vpop.eup %4082  ;;  %v3754_v56 = vpack.c.bf16 %v4025_v53, %v4024_v54  ;;  %v1669_v1 = vmul.f32 1.442695, %v1654_v57 }
 0x8a8   : > { %1672 = vadd.xlane.f32.xlu1 %v1671_v58  ;;  %v4028_v59 = vpop.permute.xlu1 %4027  ;;  %v1643_v60 = vpop.xlane.xlu0 %1642  ;;  %v1680_v61 = vsel %vm663_vm0, %v4652_v55, 0.0 }
 0x8a9   : > { %v4030_v62 = vunpack.i.h.bf16 %v4028_v59  ;;  %v4029_v63 = vunpack.i.l.bf16 %v4028_v59  ;;  %v1653_v0 = vsub.f32 %v4634_v21, %v1643_v60  ;;  %3755 = vmatprep.subr.bf16.mxu0 %v3754_v56  ;;  %1681 = vadd.xlane.f32.xlu0 %v1680_v61 }
 0x8aa   : > { %3757 = vmatpush3.bf16.msra.mxu0 %v3754_v56 }
 0x8ab   : > { %v3758_v2 = vpack.c.bf16 %v4030_v62, %v4029_v63  ;;  %v1667_v4 = vmul.f32 1.442695, %v1653_v0 }
 0x8ad   : > { %4086 = vpow2.f32 %v1667_v4  ;;  %3759 = vmatprep.subr.bf16.mxu0 %v3758_v2 }
 0x8ae   : > { %3761 = vmatpush3.bf16.msra.mxu0 %v3758_v2  ;;  %4088 = vpow2.f32 %v1669_v1 }
 0x8af   : > { %v4660_v3 = vpop.eup %4084  ;;  %4090 = vpow2.f32 %v1659_v14 }
 0x8b0   : > { %v1686_v5 = vsel %vm663_vm0, %v4660_v3, 0.0  ;;  %4092 = vpow2.f32 %v1663_v17 }
 0x8b1   : > { %1687 = vadd.xlane.f32.xlu0 %v1686_v5 }
 0x8b7   : > { %v4664_v6 = vpop.eup %4086 }
 0x8b8   : > { %v1689_v7 = vsel %vm663_vm0, %v4664_v6, 0.0  ;;  %v4668_v8 = vpop.eup %4088 }
 0x8b9   : > { %4032 = vrot.lane.b32.xlu1 %v4575_v38, %s4233_s22  ;;  %1690 = vadd.xlane.f32.xlu0 %v1689_v7  ;;  %v1692_v9 = vsel %vm663_vm0, %v4668_v8, 0.0  ;;  %v4091_v10 = vpop.eup %4090 }
 0x8ba   : > { %v1677_v20 = vsel %vm663_vm0, %v4091_v10, 0.0  ;;  %v4093_v13 = vpop.eup %4092 }
 0x8bb   : > { %v1683_v22 = vsel %vm663_vm0, %v4093_v13, 0.0 }
 0x8bd   : > { %1693 = vadd.xlane.f32.xlu0 %v1692_v9 }
 0x8c8   : > { %v2078_v12 = vpop.trf.xlu0 }
 0x8c9   : > { %3630 = vmatprep.mubr.msk.f32.mxu1 %vm1324_vm1, %v2078_v12 }
 0x8cc   : > { %v2079_v16 = vpop.trf.xlu0 }
 0x8cd   : > { %3631 = vmatmul.mubr.msk.f32.vlgmr.msra.gmra.mrb[8].mxu1 %vm1324_vm1, %v2079_v16 }
 0x8d0   : > { %v2080_v18 = vpop.trf.xlu0 }
 0x8d1   : > { %3633 = vmatprep.mubr.msk.f32.mxu1 %vm1324_vm1, %v2080_v18 }
 0x8d4   : > { %v2081_v38 = vpop.trf.xlu0 }
 0x8d5   : > { %3634 = vmatmul.mubr.msk.f32.gmra.mrb[10].mxu1 %vm1324_vm1, %v2081_v38 }
 0x8d8   : > { %v2082_v19 = vpop.trf.xlu0 }
 0x8d9   : > { %3636 = vmatprep.mubr.msk.f32.mxu1 %vm1324_vm1, %v2082_v19 }
 0x8dc   : > { %v2083_v21 = vpop.trf.xlu0 }
 0x8dd   : > { %1678 = vadd.xlane.f32.xlu1 %v1677_v20  ;;  %3637 = vmatmul.mubr.msk.f32.gmra.mrb[12].mxu1 %vm1324_vm1, %v2083_v21 }
 0x8e0   : > { %v2084_v23 = vpop.trf.xlu0 }
 0x8e1   : > { %1684 = vadd.xlane.f32.xlu1 %v1683_v22  ;;  %3639 = vmatprep.mubr.msk.f32.mxu1 %vm1324_vm1, %v2084_v23 }
 0x8e4   : > { %v2085_v24 = vpop.trf.xlu0 }
 0x8e5   : > { %3640 = vmatmul.mubr.msk.f32.gmra.mrb[14].mxu1 %vm1324_vm1, %v2085_v24 }
 0x931   : > { %v1676_v25 = vpop.xlane.xlu1 %1675 }
 0x932   : > { %4094 = vrcp.f32 %v1676_v25 }
 0x935   : > { %v1673_v26 = vpop.xlane.xlu1 %1672 }
 0x936   : > { %4096 = vrcp.f32 %v1673_v26  ;;  %v1682_v42 = vpop.xlane.xlu0 %1681 }
 0x937   : > { %4098 = vrcp.f32 %v1682_v42 }
 0x939   : > { %v4033_v27 = vpop.permute.xlu1 %4032 }
 0x93a   : > { %v4035_v28 = vunpack.i.h.bf16 %v4033_v27  ;;  %v4034_v30 = vunpack.i.l.bf16 %v4033_v27 }
 0x93c   : > { %v3762_v31 = vpack.c.bf16 %v4035_v28, %v4034_v30  ;;  %v4095_v36 = vpop.eup %4094 }
 0x93d   : > { %v1704_v40 = vmul.f32 %v4095_v36, %v4646_v45 }
 0x93e   : > { %3763 = vmatprep.subr.bf16.mxu0 %v3762_v31  ;;  %v1688_v43 = vpop.xlane.xlu0 %1687 }
 0x93f   : > { %3765 = vmatpush3.bf16.msra.mxu0 %v3762_v31 }
 0x940   : > { %v4097_v35 = vpop.eup %4096  ;;  %3767 = vmatprep.subr.bf16.mxu0 %v3766_v29 }
 0x941   : > { %v1703_v39 = vmul.f32 %v4097_v35, %v4650_v49  ;;  %v4099_v45 = vpop.eup %4098 }
 0x942   : > { %v1706_v53 = vmul.f32 %v4099_v45, %v4652_v55 }
 0x943   : > { %3590 = vmatprep.mubr.msk.f32.mxu0 %vm663_vm0, %v1703_v39 }
 0x944   : > { %3591 = vmatmul.mubr.msk.f32.vlgmr.msra.gmra.mrb[8].mxu0 %vm663_vm0, %v1704_v40 }
 0x945   : > { %3769 = vmatpush3.bf16.msra.mxu0 %v3766_v29 }
 0x946   : > { %3771 = vmatprep.subr.bf16.mxu0 %v3770_v41  ;;  %v1691_v44 = vpop.xlane.xlu0 %1690 }
 0x949   : > { %3773 = vmatpush3.bf16.msra.mxu0 %v3770_v41 }
 0x94a   : > { %v1694_v48 = vpop.xlane.xlu0 %1693 }
 0x96a   : > { %v1679_v46 = vpop.xlane.xlu1 %1678 }
 0x96b   : > { %4100 = vrcp.f32 %v1679_v46 }
 0x96c   : > { %4102 = vrcp.f32 %v1688_v43 }
 0x96d   : > { %4104 = vrcp.f32 %v1691_v44 }
 0x96e   : > { %v1685_v47 = vpop.xlane.xlu1 %1684 }
 0x96f   : > { %4106 = vrcp.f32 %v1685_v47 }
 0x970   : > { %4108 = vrcp.f32 %v1694_v48 }
 0x975   : > { %v4101_v49 = vpop.eup %4100 }
 0x976   : > { %v1705_v51 = vmul.f32 %v4101_v49, %v4091_v10  ;;  %v4103_v52 = vpop.eup %4102 }
 0x977   : > { %v4105_v54 = vpop.eup %4104  ;;  %v1708_v58 = vmul.f32 %v4103_v52, %v4660_v3 }
 0x978   : > { %3593 = vmatprep.mubr.msk.f32.mxu0 %vm663_vm0, %v1705_v51  ;;  %v1709_v60 = vmul.f32 %v4105_v54, %v4664_v6 }
 0x979   : > { %v4107_v56 = vpop.eup %4106  ;;  %3594 = vmatmul.mubr.msk.f32.gmra.mrb[10].mxu0 %vm663_vm0, %v1706_v53 }
 0x97a   : > { %v1707_v57 = vmul.f32 %v4107_v56, %v4093_v13  ;;  %v4109_v59 = vpop.eup %4108 }
 0x97b   : > { %v1710_v55 = vmul.f32 %v4109_v59, %v4668_v8 }
 0x97c   : > { %3596 = vmatprep.mubr.msk.f32.mxu0 %vm663_vm0, %v1707_v57 }
 0x97d   : > { %3597 = vmatmul.mubr.msk.f32.gmra.mrb[12].mxu0 %vm663_vm0, %v1708_v58 }
 0x97e   : > { %3599 = vmatprep.mubr.msk.f32.mxu0 %vm663_vm0, %v1709_v60 }
 0x981   : > { %3600 = vmatmul.mubr.msk.f32.gmra.mrb[14].mxu0 %vm663_vm0, %v1710_v55 }
 0x9a0   : > { %v3632_v61 = vpop.f32.mrb[8].mxu1 }
 0x9a1   : > { %v2184_v62 = vpop.f32.mrb[9].mxu1 }
 0x9a2   : > { %v4704_v63 = vpack.i.bf16 %v3632_v61, %v2184_v62 }
 0x9a4   : > { %4037 = vrot.lane.b32.xlu0 %v4704_v63, %s4232_s5 }
 0x9a8   : > { %v3635_v0 = vpop.f32.mrb[10].mxu1 }
 0x9a9   : > { %v2194_v1 = vpop.f32.mrb[11].mxu1 }
 0x9aa   : > { %v4708_v2 = vpack.i.bf16 %v3635_v0, %v2194_v1 }
 0x9ac   : > { %4042 = vrot.lane.b32.xlu1 %v4708_v2, %s4232_s5 }
 0x9b0   : > { %v3638_v4 = vpop.f32.mrb[12].mxu1 }
 0x9b1   : > { %v2204_v3 = vpop.f32.mrb[13].mxu1 }
 0x9b2   : > { %v4712_v5 = vpack.i.bf16 %v3638_v4, %v2204_v3 }
 0x9b4   : > { %4047 = vrot.lane.b32.xlu0 %v4712_v5, %s4232_s5 }
 0x9b8   : > { %v3641_v6 = vpop.f32.mrb[14].mxu1 }
 0x9b9   : > { %v2214_v7 = vpop.f32.mrb[15].mxu1 }
 0x9ba   : > { %v4716_v8 = vpack.i.bf16 %v3641_v6, %v2214_v7 }
 0x9bc   : > { %4052 = vrot.lane.b32.xlu0 %v4716_v8, %s4232_s5 }
 0xa16   : > { %v4038_v9 = vpop.permute.xlu0 %4037 }
 0xa17   : > { %v3592_v11 = vpop.f32.mrb[8].mxu0  ;;  %v4040_v12 = vunpack.i.h.bf16 %v4038_v9  ;;  %v4039_v14 = vunpack.i.l.bf16 %v4038_v9 }
 0xa18   : > { %v1825_v15 = vpop.f32.mrb[9].mxu0 }
 0xa19   : > { %3610 = vmatprep.mubr.msk.f32.mxu0 %vm1324_vm1, %v1825_v15  ;;  %v3782_v16 = vpack.c.bf16 %v4040_v12, %v4039_v14 }
 0xa1a   : > { %3611 = vmatmul.mubr.msk.f32.vlgmr.msra.gmra.mrb[16].mxu0 %vm1324_vm1, %v3592_v11 }
 0xa1b   : > { %3784 = vmatprep.subr.msk.bf16.mxu0 %vm4589_vm2, %v3782_v16 }
 0xa1c   : > { %3787 = vmatpush3.bf16.xpose.msk.msra.mxu0 %vm4589_vm2, %v3782_v16 }
 0xa1e   : > { %v4043_v17 = vpop.permute.xlu1 %4042 }
 0xa1f   : > { %v4045_v18 = vunpack.i.h.bf16 %v4043_v17  ;;  %v4044_v38 = vunpack.i.l.bf16 %v4043_v17 }
 0xa21   : > { %v3788_v19 = vpack.c.bf16 %v4045_v18, %v4044_v38 }
 0xa23   : > { %3790 = vmatprep.subr.msk.bf16.mxu0 %vm4589_vm2, %v3788_v19 }
 0xa24   : > { %3793 = vmatpush3.bf16.xpose.msk.msra.mxu0 %vm4589_vm2, %v3788_v19 }
 0xa26   : > { %v4048_v10 = vpop.permute.xlu0 %4047 }
 0xa27   : > { %v4050_v20 = vunpack.i.h.bf16 %v4048_v10  ;;  %v4049_v21 = vunpack.i.l.bf16 %v4048_v10 }
 0xa29   : > { %v3794_v13 = vpack.c.bf16 %v4050_v20, %v4049_v21 }
 0xa2b   : > { %3796 = vmatprep.subr.msk.bf16.mxu0 %vm4589_vm2, %v3794_v13 }
 0xa2c   : > { %3799 = vmatpush3.bf16.xpose.msk.msra.mxu0 %vm4589_vm2, %v3794_v13 }
 0xa2e   : > { %v4053_v22 = vpop.permute.xlu0 %4052 }
 0xa2f   : > { %v4055_v23 = vunpack.i.h.bf16 %v4053_v22  ;;  %v4054_v24 = vunpack.i.l.bf16 %v4053_v22 }
 0xa31   : > { %v3800_v25 = vpack.c.bf16 %v4055_v23, %v4054_v24 }
 0xa33   : > { %3802 = vmatprep.subr.msk.bf16.mxu0 %vm4589_vm2, %v3800_v25 }
 0xa34   : > { %3805 = vmatpush3.bf16.xpose.msk.msra.mxu0 %vm4589_vm2, %v3800_v25 }
 0xa4c   : > { %v3595_v26 = vpop.f32.mrb[10].mxu0 }
 0xa4d   : > { %v1835_v27 = vpop.f32.mrb[11].mxu0 }
 0xa4e   : > { %3613 = vmatprep.mubr.msk.f32.mxu0 %vm1324_vm1, %v1835_v27 }
 0xa4f   : > { %3614 = vmatmul.mubr.msk.f32.gmra.mrb[18].mxu0 %vm1324_vm1, %v3595_v26 }
 0xa50   : > { %v3598_v28 = vpop.f32.mrb[12].mxu0 }
 0xa51   : > { %v1845_v30 = vpop.f32.mrb[13].mxu0 }
 0xa52   : > { %3616 = vmatprep.mubr.msk.f32.mxu0 %vm1324_vm1, %v1845_v30 }
 0xa53   : > { %3617 = vmatmul.mubr.msk.f32.gmra.mrb[20].mxu0 %vm1324_vm1, %v3598_v28 }
 0xa54   : > { %v3601_v31 = vpop.f32.mrb[14].mxu0 }
 0xa55   : > { %v1855_v33 = vpop.f32.mrb[15].mxu0 }
 0xa56   : > { %3619 = vmatprep.mubr.msk.f32.mxu0 %vm1324_vm1, %v1855_v33 }
 0xa57   : > { %3620 = vmatmul.mubr.msk.f32.gmra.mrb[22].mxu0 %vm1324_vm1, %v3601_v31 }
 0xa58   : > { %3658 = vmatprep.mubr.msk.f32.mxu0 %vm1324_vm1, %v2184_v62 }
 0xa5b   : > { %3659 = vmatmul.mubr.msk.f32.vlgmr.msra.gmra.mrb[24].mxu0 %vm1324_vm1, %v3632_v61 }
 0xa5c   : > { %3661 = vmatprep.mubr.msk.f32.mxu0 %vm1324_vm1, %v2194_v1 }
 0xa5f   : > { %3662 = vmatmul.mubr.msk.f32.gmra.mrb[26].mxu0 %vm1324_vm1, %v3635_v0 }
 0xa60   : > { %3664 = vmatprep.mubr.msk.f32.mxu0 %vm1324_vm1, %v2204_v3 }
 0xa63   : > { %3665 = vmatmul.mubr.msk.f32.gmra.mrb[28].mxu0 %vm1324_vm1, %v3638_v4 }
 0xa64   : > { %3667 = vmatprep.mubr.msk.f32.mxu0 %vm1324_vm1, %v2214_v7 }
 0xa67   : > { %3668 = vmatmul.mubr.msk.f32.gmra.mrb[30].mxu0 %vm1324_vm1, %v3641_v6 }
 0xaed   : > { %v3612_v50 = vpop.f32.mrb[16].mxu0 }
 0xaee   : > { %v3255_v34 = vpack.c.bf16 %v3612_v50, %v3612_v50  ;;  %v1954_v29 = vpop.f32.mrb[17].mxu0 }
 0xaef   : > { %v3254_v36 = vpack.c.bf16 %v1954_v29, %v1954_v29 }
 0xaf0   : > { %2027 = vst.msk [vmem:[%s4421_s19 + $0x4] sm:$0xf] %vm2025_vm3, %v3255_v34 }
 0xaf1   : > { %2026 = vst.msk [vmem:[%s4421_s19] sm:$0xf] %vm2025_vm3, %v3254_v36 }
 0xb22   : > { %v3615_v32 = vpop.f32.mrb[18].mxu0 }
 0xb23   : > { %v3257_v37 = vpack.c.bf16 %v3615_v32, %v3615_v32  ;;  %v1964_v35 = vpop.f32.mrb[19].mxu0 }
 0xb24   : > { %v3256_v39 = vpack.c.bf16 %v1964_v35, %v1964_v35 }
 0xb25   : > { %2029 = vst.msk [vmem:[%s4421_s19 + $0xc] sm:$0xf] %vm2025_vm3, %v3257_v37 }
 0xb26   : > { %2028 = vst.msk [vmem:[%s4421_s19 + $0x8] sm:$0xf] %vm2025_vm3, %v3256_v39  ;;  %v3618_v40 = vpop.f32.mrb[20].mxu0 }
 0xb27   : > { %v3259_v41 = vpack.c.bf16 %v3618_v40, %v3618_v40  ;;  %v1974_v42 = vpop.f32.mrb[21].mxu0 }
 0xb28   : > { %v3258_v43 = vpack.c.bf16 %v1974_v42, %v1974_v42 }
 0xb29   : > { %2031 = vst.msk [vmem:[%s4421_s19 + $0x14] sm:$0xf] %vm2025_vm3, %v3259_v41 }
 0xb2a   : > { %2030 = vst.msk [vmem:[%s4421_s19 + $0x10] sm:$0xf] %vm2025_vm3, %v3258_v43  ;;  %v3621_v44 = vpop.f32.mrb[22].mxu0 }
 0xb2b   : > { %v3261_v46 = vpack.c.bf16 %v3621_v44, %v3621_v44  ;;  %v1984_v47 = vpop.f32.mrb[23].mxu0 }
 0xb2c   : > { %v3260_v48 = vpack.c.bf16 %v1984_v47, %v1984_v47 }
 0xb2d   : > { %2033 = vst.msk [vmem:[%s4421_s19 + $0x1c] sm:$0xf] %vm2025_vm3, %v3261_v46 }
 0xb2e   : > { %2032 = vst.msk [vmem:[%s4421_s19 + $0x18] sm:$0xf] %vm2025_vm3, %v3260_v48  ;;  %v3660_v45 = vpop.f32.mrb[24].mxu0 }
 0xb2f   : > { %v2385_v49 = vmul.f32 0.17677669, %v3660_v45  ;;  %v2345_v51 = vpop.f32.mrb[25].mxu0 }
 0xb30   : > { %v2384_v52 = vmul.f32 0.17677669, %v2345_v51 }
 0xb31   : > { %v2395_v53 = vsel %vm663_vm0, %v2385_v49, -inf }
 0xb32   : > { %2396 = vmax.xlane.f32.xlu0 %v2395_v53  ;;  %v3663_v54 = vpop.f32.mrb[26].mxu0  ;;  %v2392_v56 = vsel %vm663_vm0, %v2384_v52, -inf }
 0xb33   : > { %2393 = vmax.xlane.f32.xlu1 %v2392_v56  ;;  %v2355_v57 = vpop.f32.mrb[27].mxu0  ;;  %v2387_v59 = vmul.f32 0.17677669, %v3663_v54 }
 0xb34   : > { %v2386_v58 = vmul.f32 0.17677669, %v2355_v57 }
 0xb35   : > { %v2401_v4 = vsel %vm663_vm0, %v2387_v59, -inf }
 0xb36   : > { %v3666_v60 = vpop.f32.mrb[28].mxu0  ;;  %v2398_v55 = vsel %vm663_vm0, %v2386_v58, -inf }
 0xb37   : > { %2399 = vmax.xlane.f32.xlu0 %v2398_v55  ;;  %v2365_v61 = vpop.f32.mrb[29].mxu0  ;;  %v2389_v0 = vmul.f32 0.17677669, %v3666_v60 }
 0xb38   : > { %v2388_v62 = vmul.f32 0.17677669, %v2365_v61 }
 0xb39   : > { %v2407_v11 = vsel %vm663_vm0, %v2389_v0, -inf }
 0xb3a   : > { %v3669_v1 = vpop.f32.mrb[30].mxu0  ;;  %v2404_v3 = vsel %vm663_vm0, %v2388_v62, -inf }
 0xb3b   : > { %2402 = vmax.xlane.f32.xlu0 %v2401_v4  ;;  %2405 = vmax.xlane.f32.xlu1 %v2404_v3  ;;  %v2375_v6 = vpop.f32.mrb[31].mxu0  ;;  %v2391_v9 = vmul.f32 0.17677669, %v3669_v1 }
 0xb3c   : > { %v2390_v7 = vmul.f32 0.17677669, %v2375_v6 }
 0xb3d   : > { %v2413_v14 = vsel %vm663_vm0, %v2391_v9, -inf }
 0xb3e   : > { %v2410_v12 = vsel %vm663_vm0, %v2390_v7, -inf }
 0xb3f   : > { %2408 = vmax.xlane.f32.xlu0 %v2407_v11  ;;  %2411 = vmax.xlane.f32.xlu1 %v2410_v12 }
 0xb43   : > { %2414 = vmax.xlane.f32.xlu0 %v2413_v14 }
 0xb50   : > { %4057 = vrot.lane.b32.xlu1 %v4704_v63, %s4233_s22 }
 0xbbf   : > { %v2397_v15 = vpop.xlane.xlu0 %2396 }
 0xbc0   : > { %v2417_v16 = vsub.f32 %v2385_v49, %v2397_v15  ;;  %v2394_v17 = vpop.xlane.xlu1 %2393 }
 0xbc1   : > { %v2416_v18 = vsub.f32 %v2384_v52, %v2394_v17 }
 0xbc2   : > { %v2426_v38 = vmul.f32 1.442695, %v2417_v16 }
 0xbc3   : > { %v2424_v19 = vmul.f32 1.442695, %v2416_v18  ;;  %v1270_v18 = vld [vmem:[%s4426_s18 + $0x20] sm:$0xff] }
 0xbc4   : > { %4110 = vpow2.f32 %v2426_v38  ;;  %v2400_v10 = vpop.xlane.xlu0 %2399  ;;  %v1271_v38 = vld [vmem:[%s4426_s18 + $0x28] sm:$0xff] }
 0xbc5   : > { %4112 = vpow2.f32 %v2424_v19  ;;  %v2418_v20 = vsub.f32 %v2386_v58, %v2400_v10 }
 0xbc7   : > { %v2428_v21 = vmul.f32 1.442695, %v2418_v20  ;;  %v3822_v20 = vpack.c.bf16 %v1271_v38, %v1270_v18 }
 0xbc8   : > { %v2403_v13 = vpop.xlane.xlu0 %2402  ;;  %v2406_v22 = vpop.xlane.xlu1 %2405 }
 0xbc9   : > { %4114 = vpow2.f32 %v2428_v21  ;;  %v2419_v23 = vsub.f32 %v2387_v59, %v2403_v13  ;;  %v2420_v24 = vsub.f32 %v2388_v62, %v2406_v22  ;;  %v1272_v13 = vld [vmem:[%s4426_s18 + $0x30] sm:$0xff]  ;;  %v1273_v22 = vld [vmem:[%s4426_s18 + $0x38] sm:$0xff] }
 0xbcb   : > { %v2430_v25 = vmul.f32 1.442695, %v2419_v23  ;;  %v2432_v26 = vmul.f32 1.442695, %v2420_v24 }
 0xbcc   : > { %v2409_v27 = vpop.xlane.xlu0 %2408  ;;  %v2412_v63 = vpop.xlane.xlu1 %2411 }
 0xbcd   : > { %4116 = vpow2.f32 %v2430_v25  ;;  %v2421_v28 = vsub.f32 %v2389_v0, %v2409_v27  ;;  %v2422_v50 = vsub.f32 %v2390_v7, %v2412_v63 }
 0xbce   : > { %v4778_v30 = vpop.eup %4110  ;;  %4118 = vpow2.f32 %v2432_v26  ;;  %v3826_v26 = vpack.c.bf16 %v1273_v22, %v1272_v13 }
 0xbcf   : > { %v4113_v31 = vpop.eup %4112  ;;  %v2434_v33 = vmul.f32 1.442695, %v2421_v28  ;;  %v2443_v34 = vsel %vm663_vm0, %v4778_v30, 0.0  ;;  %v2436_v41 = vmul.f32 1.442695, %v2422_v50 }
 0xbd0   : > { %2444 = vadd.xlane.f32.xlu0 %v2443_v34  ;;  %v2415_v29 = vpop.xlane.xlu0 %2414  ;;  %v4058_v36 = vpop.permute.xlu1 %4057  ;;  %v2440_v32 = vsel %vm663_vm0, %v4113_v31, 0.0 }
 0xbd1   : > { %4120 = vpow2.f32 %v2434_v33  ;;  %v2423_v37 = vsub.f32 %v2391_v9, %v2415_v29  ;;  %v4060_v35 = vunpack.i.h.bf16 %v4058_v36  ;;  %v4059_v39 = vunpack.i.l.bf16 %v4058_v36  ;;  %2441 = vadd.xlane.f32.xlu1 %v2440_v32 }
 0xbd3   : > { %v4115_v40 = vpop.eup %4114  ;;  %v2438_v42 = vmul.f32 1.442695, %v2423_v37  ;;  %v3806_v43 = vpack.c.bf16 %v4060_v35, %v4059_v39 }
 0xbd4   : > { %v2446_v44 = vsel %vm663_vm0, %v4115_v40, 0.0 }
 0xbd5   : > { %4122 = vpow2.f32 %v2438_v42  ;;  %2447 = vadd.xlane.f32.xlu1 %v2446_v44  ;;  %3807 = vmatprep.subr.bf16.mxu0 %v3806_v43 }
 0xbd6   : > { %3830 = vmatprep.subr.bf16.mxu1 %v3806_v43  ;;  %3809 = vmatpush3.bf16.msra.mxu0 %v3806_v43  ;;  %4124 = vpow2.f32 %v2436_v41 }
 0xbd7   : > { %v4784_v46 = vpop.eup %4116  ;;  %3834 = vmatpush3.bf16.msra.mxu1 %v3806_v43 }
 0xbd8   : > { %v4786_v47 = vpop.eup %4118  ;;  %v2449_v48 = vsel %vm663_vm0, %v4784_v46, 0.0 }
 0xbd9   : > { %2450 = vadd.xlane.f32.xlu0 %v2449_v48  ;;  %v2452_v45 = vsel %vm663_vm0, %v4786_v47, 0.0 }
 0xbda   : > { %2453 = vadd.xlane.f32.xlu1 %v2452_v45 }
 0xbdb   : > { %v4792_v49 = vpop.eup %4120 }
 0xbdc   : > { %v2455_v51 = vsel %vm663_vm0, %v4792_v49, 0.0 }
 0xbdd   : > { %2456 = vadd.xlane.f32.xlu0 %v2455_v51 }
 0xbdf   : > { %v4796_v52 = vpop.eup %4122 }
 0xbe0   : > { %v2461_v53 = vsel %vm663_vm0, %v4796_v52, 0.0  ;;  %v4800_v54 = vpop.eup %4124 }
 0xbe1   : > { %2462 = vadd.xlane.f32.xlu0 %v2461_v53  ;;  %v2458_v56 = vsel %vm663_vm0, %v4800_v54, 0.0 }
 0xbe5   : > { %2459 = vadd.xlane.f32.xlu0 %v2458_v56 }
 0xbeb   : > { %4067 = vrot.lane.b32.xlu1 %v4712_v5, %s4233_s22 }
 0xbef   : > { %4072 = vrot.lane.b32.xlu1 %v4716_v8, %s4233_s22 }
 0xbfb   : > { %4062 = vrot.lane.b32.xlu0 %v4708_v2, %s4233_s22 }
 0xc5d   : > { %v2445_v58 = vpop.xlane.xlu0 %2444 }
 0xc5e   : > { %v2442_v57 = vpop.xlane.xlu1 %2441 }
 0xc5f   : > { %4126 = vrcp.f32 %v2442_v57 }
 0xc62   : > { %v2448_v59 = vpop.xlane.xlu1 %2447 }
 0xc63   : > { %4128 = vrcp.f32 %v2448_v59 }
 0xc64   : > { %4130 = vrcp.f32 %v2445_v58 }
 0xc66   : > { %v2451_v60 = vpop.xlane.xlu0 %2450 }
 0xc67   : > { %v2454_v0 = vpop.xlane.xlu1 %2453  ;;  %4132 = vrcp.f32 %v2451_v60 }
 0xc68   : > { %4134 = vrcp.f32 %v2454_v0 }
 0xc69   : > { %v4127_v55 = vpop.eup %4126 }
 0xc6a   : > { %v2457_v61 = vpop.xlane.xlu0 %2456  ;;  %v2472_v62 = vmul.f32 %v4127_v55, %v4113_v31 }
 0xc6b   : > { %v4068_v8 = vpop.permute.xlu1 %4067  ;;  %4136 = vrcp.f32 %v2457_v61 }
 0xc6c   : > { %3686 = vmatprep.mubr.msk.f32.mxu0 %vm663_vm0, %v2472_v62  ;;  %v4070_v6 = vunpack.i.h.bf16 %v4068_v8  ;;  %v4069_v7 = vunpack.i.l.bf16 %v4068_v8 }
 0xc6d   : > { %v4129_v1 = vpop.eup %4128 }
 0xc6e   : > { %v2463_v5 = vpop.xlane.xlu0 %2462  ;;  %v2474_v4 = vmul.f32 %v4129_v1, %v4115_v40  ;;  %v3814_v15 = vpack.c.bf16 %v4070_v6, %v4069_v7  ;;  %v4131_v10 = vpop.eup %4130 }
 0xc6f   : > { %v4073_v12 = vpop.permute.xlu1 %4072  ;;  %v2473_v24 = vmul.f32 %v4131_v10, %v4778_v30 }
 0xc70   : > { %3689 = vmatprep.mubr.msk.f32.mxu1 %vm663_vm0, %v2474_v4  ;;  %v4075_v16 = vunpack.i.h.bf16 %v4073_v12  ;;  %v4074_v17 = vunpack.i.l.bf16 %v4073_v12 }
 0xc71   : > { %v4133_v21 = vpop.eup %4132 }
 0xc72   : > { %v2460_v3 = vpop.xlane.xlu0 %2459  ;;  %v3818_v19 = vpack.c.bf16 %v4075_v16, %v4074_v17  ;;  %v4135_v23 = vpop.eup %4134  ;;  %v2475_v25 = vmul.f32 %v4133_v21, %v4784_v46 }
 0xc73   : > { %4138 = vrcp.f32 %v2460_v3  ;;  %v2476_v63 = vmul.f32 %v4135_v23, %v4786_v47 }
 0xc74   : > { %4140 = vrcp.f32 %v2463_v5 }
 0xc75   : > { %v4137_v27 = vpop.eup %4136 }
 0xc76   : > { %v4063_v2 = vpop.permute.xlu0 %4062  ;;  %v2477_v31 = vmul.f32 %v4137_v27, %v4792_v49 }
 0xc77   : > { %v4065_v9 = vunpack.i.h.bf16 %v4063_v2  ;;  %v4064_v11 = vunpack.i.l.bf16 %v4063_v2 }
 0xc79   : > { %v3810_v14 = vpack.c.bf16 %v4065_v9, %v4064_v11 }
 0xc7b   : > { %3811 = vmatprep.subr.bf16.mxu0 %v3810_v14  ;;  %3831 = vmatprep.subr.bf16.mxu1 %v3810_v14 }
 0xc7c   : > { %3813 = vmatpush3.bf16.msra.mxu0 %v3810_v14  ;;  %3835 = vmatpush3.bf16.msra.mxu1 %v3810_v14 }
 0xc7d   : > { %3815 = vmatprep.subr.bf16.mxu0 %v3814_v15  ;;  %3832 = vmatprep.subr.bf16.mxu1 %v3814_v15  ;;  %v4139_v28 = vpop.eup %4138 }
 0xc7e   : > { %v4141_v33 = vpop.eup %4140  ;;  %v2478_v30 = vmul.f32 %v4139_v28, %v4800_v54 }
 0xc7f   : > { %v2479_v50 = vmul.f32 %v4141_v33, %v4796_v52 }
 0xc80   : > { %3817 = vmatpush3.bf16.msra.mxu0 %v3814_v15  ;;  %3836 = vmatpush3.bf16.msra.mxu1 %v3814_v15 }
 0xc81   : > { %3819 = vmatprep.subr.bf16.mxu0 %v3818_v19  ;;  %3833 = vmatprep.subr.bf16.mxu1 %v3818_v19 }
 0xc84   : > { %3821 = vmatpush3.bf16.msra.mxu0 %v3818_v19  ;;  %3837 = vmatpush3.bf16.msra.mxu1 %v3818_v19 }
 0xc85   : > { %3823 = vmatprep.subr.bf16.mxu1 %v3822_v20 }
 0xc87   : > { %3687 = vmatmul.mubr.msk.f32.vlgmr.msra.gmra.mrb[32].mxu0 %vm663_vm0, %v2473_v24  ;;  %3690 = vmatmul.mubr.msk.f32.vlgmr.msra.gmra.mrb[16].mxu1 %vm663_vm0, %v2475_v25 }
 0xc88   : > { %3692 = vmatprep.mubr.msk.f32.mxu1 %vm663_vm0, %v2476_v63  ;;  %3825 = vmatpush3.bf16.msra.mxu1 %v3822_v20 }
 0xc89   : > { %3827 = vmatprep.subr.bf16.mxu1 %v3826_v26 }
 0xc8b   : > { %3693 = vmatmul.mubr.msk.f32.gmra.mrb[18].mxu1 %vm663_vm0, %v2477_v31 }
 0xc8c   : > { %3695 = vmatprep.mubr.msk.f32.mxu1 %vm663_vm0, %v2478_v30  ;;  %3829 = vmatpush3.bf16.msra.mxu1 %v3826_v26 }
 0xc8f   : > { %3696 = vmatmul.mubr.msk.f32.gmra.mrb[20].mxu1 %vm663_vm0, %v2479_v50 }
 0xd5a   : > { %v3688_v34 = vpop.f32.mrb[32].mxu0  ;;  %v3691_v29 = vpop.f32.mrb[16].mxu1 }
 0xd5b   : > { %v2594_v36 = vpop.f32.mrb[33].mxu0  ;;  %v2604_v32 = vpop.f32.mrb[17].mxu1 }
 0xd5c   : > { %3706 = vmatprep.mubr.msk.f32.mxu1 %vm1324_vm1, %v2594_v36 }
 0xd5d   : > { %3707 = vmatmul.mubr.msk.f32.vlgmr.msra.gmra.mrb[22].mxu1 %vm1324_vm1, %v3688_v34 }
 0xd5e   : > { %v3694_v37 = vpop.f32.mrb[18].mxu1  ;;  %3709 = vmatprep.mubr.msk.f32.mxu1 %vm1324_vm1, %v2604_v32 }
 0xd5f   : > { %v2614_v35 = vpop.f32.mrb[19].mxu1 }
 0xd61   : > { %3710 = vmatmul.mubr.msk.f32.gmra.mrb[24].mxu1 %vm1324_vm1, %v3691_v29 }
 0xd62   : > { %v3697_v39 = vpop.f32.mrb[20].mxu1  ;;  %3712 = vmatprep.mubr.msk.f32.mxu1 %vm1324_vm1, %v2614_v35 }
 0xd63   : > { %v2624_v40 = vpop.f32.mrb[21].mxu1 }
 0xd65   : > { %3713 = vmatmul.mubr.msk.f32.gmra.mrb[26].mxu1 %vm1324_vm1, %v3694_v37 }
 0xd66   : > { %3715 = vmatprep.mubr.msk.f32.mxu1 %vm1324_vm1, %v2624_v40 }
 0xd69   : > { %3716 = vmatmul.mubr.msk.f32.gmra.mrb[28].mxu1 %vm1324_vm1, %v3697_v39 }
 0xe30   : > { %v3708_v41 = vpop.f32.mrb[22].mxu1 }
 0xe31   : > { %v3263_v42 = vpack.c.bf16 %v3708_v41, %v3708_v41  ;;  %v2723_v43 = vpop.f32.mrb[23].mxu1 }
 0xe32   : > { %v3262_v44 = vpack.c.bf16 %v2723_v43, %v2723_v43 }
 0xe33   : > { %2795 = vst.msk [vmem:[%s4421_s19 + $0x24] sm:$0xf] %vm2025_vm3, %v3263_v42 }
 0xe34   : > { %2794 = vst.msk [vmem:[%s4421_s19 + $0x20] sm:$0xf] %vm2025_vm3, %v3262_v44  ;;  %v3711_v46 = vpop.f32.mrb[24].mxu1 }
 0xe35   : > { %v3265_v47 = vpack.c.bf16 %v3711_v46, %v3711_v46  ;;  %v2733_v48 = vpop.f32.mrb[25].mxu1 }
 0xe36   : > { %v3264_v45 = vpack.c.bf16 %v2733_v48, %v2733_v48 }
 0xe37   : > { %2797 = vst.msk [vmem:[%s4421_s19 + $0x2c] sm:$0xf] %vm2025_vm3, %v3265_v47 }
 0xe38   : > { %2796 = vst.msk [vmem:[%s4421_s19 + $0x28] sm:$0xf] %vm2025_vm3, %v3264_v45  ;;  %v3714_v49 = vpop.f32.mrb[26].mxu1 }
 0xe39   : > { %v3267_v51 = vpack.c.bf16 %v3714_v49, %v3714_v49  ;;  %v2743_v52 = vpop.f32.mrb[27].mxu1 }
 0xe3a   : > { %v3266_v53 = vpack.c.bf16 %v2743_v52, %v2743_v52 }
 0xe3b   : > { %2799 = vst.msk [vmem:[%s4421_s19 + $0x34] sm:$0xf] %vm2025_vm3, %v3267_v51 }
 0xe3c   : > { %2798 = vst.msk [vmem:[%s4421_s19 + $0x30] sm:$0xf] %vm2025_vm3, %v3266_v53  ;;  %v3717_v54 = vpop.f32.mrb[28].mxu1 }
 0xe3d   : > { %v3269_v56 = vpack.c.bf16 %v3717_v54, %v3717_v54  ;;  %v2753_v57 = vpop.f32.mrb[29].mxu1 }
 0xe3e   : > { %v3268_v58 = vpack.c.bf16 %v2753_v57, %v2753_v57 }
 0xe3f   : > { %2801 = vst.msk [vmem:[%s4421_s19 + $0x3c] sm:$0xf] %vm2025_vm3, %v3269_v56 }
 0xe40   : > { %2800 = vst.msk [vmem:[%s4421_s19 + $0x38] sm:$0xf] %vm2025_vm3, %v3268_v58 }
 0xe41 PF: > { %2817 = sbr.rel (!%p4370_p9) target bundleno = 3663 (0xe4f), region = 105  ;;  %s3270_s18 = sshll.u32 (%p4370_p9), %s4204_s13, 4  ;;  %v2840_v59 = vld [vmem:[%s4430_s29] sm:$0xf] (%p4370_p9)  ;;  %v2842_v60 = vld [vmem:[%s4430_s29 + $0x4] sm:$0xf] (%p4370_p9) }
 0xe42   : > { %s3241_s28 = sshll.u32 (%p4370_p9), %s4212_s15, 6  ;;  %s2820_s19 = sadd.s32 (%p4370_p9), %s4208_s14, %s3270_s18  ;;  %v2844_v55 = vld [vmem:[%s4430_s29 + $0x8] sm:$0xf] (%p4370_p9)  ;;  %v2846_v61 = vld [vmem:[%s4430_s29 + $0xc] sm:$0xf] (%p4370_p9) }
 0xe43   : > { %v2848_v62 = vld [vmem:[%s4430_s29 + $0x10] sm:$0xf] (%p4370_p9)  ;;  %s2822_s6 = sadd.s32 (%p4370_p9), %s3241_s28, %s2820_s19  ;;  %v2850_v0 = vld [vmem:[%s4430_s29 + $0x14] sm:$0xf] (%p4370_p9)  ;;  %v2852_v1 = vld [vmem:[%s4430_s29 + $0x18] sm:$0xf] (%p4370_p9) }
 0xe44   : > { %v2854_v5 = vld [vmem:[%s4430_s29 + $0x1c] sm:$0xf] (%p4370_p9)  ;;  %s3242_s17 = sshll.u32 (%p4370_p9), %s2822_s6, 2  ;;  %s4947_s10 = sld [smem:[#allocation21_spill]] (%p4370_p9) }
 0xe4a   : > { %s2824_s21 = scalar_lea.vmem %s4947_s10, %s3242_s17 }
 0xe4b   : > { %2841 = vst [vmem:[%s2824_s21] sm:$0xf] %v2840_v59  ;;  %2843 = vst [vmem:[%s2824_s21 + $0x8] sm:$0xf] %v2842_v60 }
 0xe4c   : > { %2845 = vst [vmem:[%s2824_s21 + $0x10] sm:$0xf] %v2844_v55  ;;  %2847 = vst [vmem:[%s2824_s21 + $0x18] sm:$0xf] %v2846_v61 }
 0xe4d   : > { %2849 = vst [vmem:[%s2824_s21 + $0x20] sm:$0xf] %v2848_v62  ;;  %2851 = vst [vmem:[%s2824_s21 + $0x28] sm:$0xf] %v2850_v0 }
 0xe4e   : > { %2853 = vst [vmem:[%s2824_s21 + $0x30] sm:$0xf] %v2852_v1  ;;  %2855 = vst [vmem:[%s2824_s21 + $0x38] sm:$0xf] %v2854_v5 }
 0xe4f PF: > { %s4948_s13 = sld [smem:[#allocation11_spill]]  ;;  %s4949_s30 = sld [smem:[#allocation6_spill]] }
 0xe50   : > { %s4950_s10 = sld [smem:[#allocation16_spill]]  ;;  %s4951_s11 = sld [smem:[#allocation7_spill]] }
 0xe51   : > { %s4952_s12 = sld [smem:[#allocation15_spill]]  ;;  %s4954_s14 = sld [smem:[#allocation9_spill]] }
 0xe52   : > { %s4955_s15 = sld [smem:[#allocation10_spill]]  ;;  %s4956_s16 = sld [smem:[#allocation12_spill]] }
 0xe53   : > { %s4957_s17 = sld [smem:[#allocation13_spill]]  ;;  %s4958_s18 = sld [smem:[#allocation14_spill]] }
 0xe55   : > { %s20_s19 = sadd.s32 1, %s4948_s13   ;;  %s4953_s13 = sld [smem:[#allocation8_spill]] }
 0xe56   : > { %p17_p8 = scmp.ge.s32.totalorder %s20_s19, 18  }
 0xe58   :  { %19 = sbr.rel (!%p17_p8) target bundleno = 12 (0xc), region = 204 }

</bundles_post_ra>
